<compile_context>
chip_gen: v7x
topology: tpu7x:2x2x1
jax: 0.10.0
libtpu: 0.0.40
codegen_flags: <defaults>
</compile_context>

<pallas_src>
import jax
import jax.numpy as jnp
from jax.experimental import pallas as pl
from jax.experimental.pallas import tpu as pltpu

INTERNAL_DIM = 768
IN_DIM = INTERNAL_DIM * 2      # 1536
H1 = 256
H2 = 128
OUT_DIM = 8 * 23               # 184 (not lane-aligned)
OUT_PAD = 256                  # lane-dense padded fc3 width
LN_EPS = 1e-5
MAX_TB = 1024                  # batch tile cap
SUB = 16                       # bf16 packs 2 rows/sublane; keep tiles aligned


def _layernorm_f32(x, gamma, beta):
    # Single pass: var = E[x^2] - E[x]^2 (matches torch's biased variance).
    mu = jnp.mean(x, axis=-1, keepdims=True)
    ms = jnp.mean(x * x, axis=-1, keepdims=True)
    var = ms - mu * mu
    return (x - mu) * jax.lax.rsqrt(var + LN_EPS) * gamma + beta


def fovea_kernel(mem_ref, cls_ref,
                 w1a_ref, w1b_ref, b1_ref, g1_ref, be1_ref,
                 w2_ref, b2_ref, g2_ref, be2_ref,
                 w3_ref, b3_ref,
                 o_ref):
    mem = mem_ref[...]                                         # (TB, 768) bf16
    cls = cls_ref[...]                                         # (TB, 768) bf16

    # ---- fc1 (split over the concat halves; bf16 MXU, f32 accumulate) ----
    h1 = (jnp.dot(mem, w1a_ref[...], preferred_element_type=jnp.float32)
          + jnp.dot(cls, w1b_ref[...], preferred_element_type=jnp.float32)
          + b1_ref[...])
    h1 = jnp.maximum(_layernorm_f32(h1, g1_ref[...], be1_ref[...]), 0.0)
    # dropout: identity (eval mode)

    # ---- fc2 + LayerNorm + ReLU ----
    h2 = (jnp.dot(h1.astype(jnp.bfloat16), w2_ref[...],
                  preferred_element_type=jnp.float32)
          + b2_ref[...])
    h2 = jnp.maximum(_layernorm_f32(h2, g2_ref[...], be2_ref[...]), 0.0)
    # dropout: identity (eval mode)

    # ---- fc3 (padded to 256 lanes) + sigmoid ----
    h3 = (jnp.dot(h2.astype(jnp.bfloat16), w3_ref[...],
                  preferred_element_type=jnp.float32)
          + b3_ref[...])
    o_ref[...] = jax.nn.sigmoid(h3).astype(o_ref.dtype)        # (TB, 256) lane-dense


def _round_up(x, m):
    return ((x + m - 1) // m) * m


def fovea_pos_predictor(memory_encoding, cls_token, params):
    """memory_encoding: (B, 768), cls_token: (B, 768) -> (B, 184) f32."""
    B = memory_encoding.shape[0]
    (w1, b1, g1, be1, w2, b2, g2, be2, w3, b3) = params

    # Matmul operands stored as bf16; bias / LN params stay f32 (added on the
    # f32 accumulator).  fc1 weight split over the concat halves.
    w1a = w1[:INTERNAL_DIM, :].astype(jnp.bfloat16)            # (768, 256)
    w1b = w1[INTERNAL_DIM:, :].astype(jnp.bfloat16)            # (768, 256)
    w2b = w2.astype(jnp.bfloat16)                              # (256, 128)
    # Pad fc3 to a lane-dense output width (padded lanes -> sigmoid(0)=0.5,
    # sliced off below).
    w3p = jnp.pad(w3, ((0, 0), (0, OUT_PAD - OUT_DIM))).astype(jnp.bfloat16)
    b3p = jnp.pad(b3, ((0, 0), (0, OUT_PAD - OUT_DIM)))        # (1, 256) f32

    mem = memory_encoding.astype(jnp.bfloat16)
    cls = cls_token.astype(jnp.bfloat16)

    # Batch tiling: pad B to a packed-tile multiple, cap the tile, and make
    # sure the grid has >= 2 tiles whenever possible so both v7x TensorCores
    # share the (memory-bound) work.
    Bp = _round_up(B, SUB)
    TB = min(MAX_TB, Bp)
    if Bp > SUB and Bp // TB < 2:
        TB = max(SUB, _round_up(-(-Bp // 2), SUB))
    Bp = _round_up(Bp, TB)
    if Bp != B:
        pad = Bp - B
        mem = jnp.pad(mem, ((0, pad), (0, 0)))
        cls = jnp.pad(cls, ((0, pad), (0, 0)))

    grid = (Bp // TB,)

    mem_spec = pl.BlockSpec((TB, INTERNAL_DIM), lambda i: (i, 0))
    cls_spec = pl.BlockSpec((TB, INTERNAL_DIM), lambda i: (i, 0))
    out_spec = pl.BlockSpec((TB, OUT_PAD), lambda i: (i, 0))

    def resident(a):
        # Full-array block, constant index -> fetched once, single-buffered.
        return pl.BlockSpec(a.shape, lambda i: (0,) * a.ndim,
                            pipeline_mode=pl.Buffered(1))

    weights = (w1a, w1b, b1, g1, be1, w2b, b2, g2, be2, w3p, b3p)
    in_specs = [mem_spec, cls_spec] + [resident(a) for a in weights]

    weight_bytes = sum(int(a.size) * a.dtype.itemsize for a in weights)
    cost = pl.CostEstimate(
        flops=2 * Bp * (IN_DIM * H1 + H1 * H2 + H2 * OUT_PAD),
        transcendentals=Bp * (OUT_DIM + 2),     # 1 sigmoid row + 2 rsqrt / row
        bytes_accessed=(Bp * (2 * INTERNAL_DIM * 2     # bf16 activation reads
                              + OUT_PAD * 4)           # f32 output writeback
                        + weight_bytes),
    )

    out = pl.pallas_call(
        fovea_kernel,
        grid_spec=pltpu.PrefetchScalarGridSpec(
            num_scalar_prefetch=0,
            grid=grid,
            in_specs=in_specs,
            out_specs=out_spec,
        ),
        out_shape=jax.ShapeDtypeStruct((Bp, OUT_PAD), jnp.float32),
        compiler_params=pltpu.CompilerParams(
            dimension_semantics=("parallel",),   # megacore sharding on v7x
            vmem_limit_bytes=64 << 20,           # ~15 MiB used; headroom for TB=1024
        ),
        cost_estimate=cost,
    )(mem, cls, *weights)

    return out[:B, :OUT_DIM]


def init_params(key):
    """Deterministic synthetic parameters (shapes match the torch module)."""
    ks = jax.random.split(key, 6)

    def lin(kw, kb, fan_in, fan_out):
        lim = 1.0 / jnp.sqrt(fan_in)
        w = jax.random.uniform(kw, (fan_in, fan_out), jnp.float32, -lim, lim)
        b = jax.random.uniform(kb, (1, fan_out), jnp.float32, -lim, lim)
        return w, b

    w1, b1 = lin(ks[0], ks[1], IN_DIM, H1)
    w2, b2 = lin(ks[2], ks[3], H1, H2)
    w3, b3 = lin(ks[4], ks[5], H2, OUT_DIM)
    g1, be1 = jnp.ones((1, H1), jnp.float32), jnp.zeros((1, H1), jnp.float32)
    g2, be2 = jnp.ones((1, H2), jnp.float32), jnp.zeros((1, H2), jnp.float32)
    return (w1, b1, g1, be1, w2, b2, g2, be2, w3, b3)


def reference(memory_encoding, cls_token, params):
    """Pure-JAX f32 reference for verification."""
    (w1, b1, g1, be1, w2, b2, g2, be2, w3, b3) = params

    def ln(x, g, b):
        mu = jnp.mean(x, axis=-1, keepdims=True)
        var = jnp.mean((x - mu) ** 2, axis=-1, keepdims=True)
        return (x - mu) * jax.lax.rsqrt(var + LN_EPS) * g + b

    x = jnp.concatenate([memory_encoding, cls_token], axis=-1)
    h = jnp.maximum(ln(x @ w1 + b1, g1, be1), 0.0)
    h = jnp.maximum(ln(h @ w2 + b2, g2, be2), 0.0)
    return jax.nn.sigmoid(h @ w3 + b3)


if __name__ == "__main__":
    key = jax.random.PRNGKey(0)
    k_mem, k_cls, k_par = jax.random.split(key, 3)

    B = 2
    memory_encoding = jax.random.normal(k_mem, (B, INTERNAL_DIM), jnp.float32)
    cls_token = jax.random.normal(k_cls, (B, INTERNAL_DIM), jnp.float32)
    params = init_params(k_par)

    out = fovea_pos_predictor(memory_encoding, cls_token, params)
    out = jax.block_until_ready(out)

    ref = reference(memory_encoding, cls_token, params)
    assert out.shape == (B, OUT_DIM)
    # bf16 MXU operands -> loosened tolerance vs the f32 reference.
    assert jnp.allclose(out, ref, atol=2e-2, rtol=2e-2), "mismatch vs reference"
    assert bool(jnp.all(jnp.isfinite(out))), "non-finite output"

    print("KERNEL_OK")
</pallas_src>

<mosaic_0001>
module attributes {stable_mosaic.version = 11 : i64} {
  func.func @fovea_kernel(%arg0: i32, %arg1: memref<16x768xbf16, #tpu.memory_space<vmem>>, %arg2: memref<16x768xbf16, #tpu.memory_space<vmem>>, %arg3: memref<768x256xbf16, #tpu.memory_space<vmem>>, %arg4: memref<768x256xbf16, #tpu.memory_space<vmem>>, %arg5: memref<1x256xf32, #tpu.memory_space<vmem>>, %arg6: memref<1x256xf32, #tpu.memory_space<vmem>>, %arg7: memref<1x256xf32, #tpu.memory_space<vmem>>, %arg8: memref<256x128xbf16, #tpu.memory_space<vmem>>, %arg9: memref<1x128xf32, #tpu.memory_space<vmem>>, %arg10: memref<1x128xf32, #tpu.memory_space<vmem>>, %arg11: memref<1x128xf32, #tpu.memory_space<vmem>>, %arg12: memref<128x256xbf16, #tpu.memory_space<vmem>>, %arg13: memref<1x256xf32, #tpu.memory_space<vmem>>, %arg14: memref<16x256xf32, #tpu.memory_space<vmem>>) attributes {dimension_semantics = [#tpu.dimension_semantics<parallel>], iteration_bounds = array<i64: 1>, scalar_prefetch = 0 : i64, scratch_operands = 0 : i64, tpu.core_type = #tpu.core_type<tc>, window_params = [{transform_indices = @transform_0, window_bounds = array<i64: 16, 768>}, {transform_indices = @transform_1, window_bounds = array<i64: 16, 768>}, {pipeline_mode = #tpu.pipeline_mode<synchronous>, transform_indices = @transform_2, window_bounds = array<i64: 768, 256>}, {pipeline_mode = #tpu.pipeline_mode<synchronous>, transform_indices = @transform_3, window_bounds = array<i64: 768, 256>}, {pipeline_mode = #tpu.pipeline_mode<synchronous>, transform_indices = @transform_4, window_bounds = array<i64: 1, 256>}, {pipeline_mode = #tpu.pipeline_mode<synchronous>, transform_indices = @transform_5, window_bounds = array<i64: 1, 256>}, {pipeline_mode = #tpu.pipeline_mode<synchronous>, transform_indices = @transform_6, window_bounds = array<i64: 1, 256>}, {pipeline_mode = #tpu.pipeline_mode<synchronous>, transform_indices = @transform_7, window_bounds = array<i64: 256, 128>}, {pipeline_mode = #tpu.pipeline_mode<synchronous>, transform_indices = @transform_8, window_bounds = array<i64: 1, 128>}, {pipeline_mode = #tpu.pipeline_mode<synchronous>, transform_indices = @transform_9, window_bounds = array<i64: 1, 128>}, {pipeline_mode = #tpu.pipeline_mode<synchronous>, transform_indices = @transform_10, window_bounds = array<i64: 1, 128>}, {pipeline_mode = #tpu.pipeline_mode<synchronous>, transform_indices = @transform_11, window_bounds = array<i64: 128, 256>}, {pipeline_mode = #tpu.pipeline_mode<synchronous>, transform_indices = @transform_12, window_bounds = array<i64: 1, 256>}, {transform_indices = @transform_13, window_bounds = array<i64: 16, 256>}]} {
    %c0 = arith.constant 0 : index
    %c0_0 = arith.constant 0 : index
    %0 = vector.load %arg1[%c0, %c0_0] : memref<16x768xbf16, #tpu.memory_space<vmem>>, vector<16x768xbf16>
    %c0_1 = arith.constant 0 : index
    %c0_2 = arith.constant 0 : index
    %1 = vector.load %arg2[%c0_1, %c0_2] : memref<16x768xbf16, #tpu.memory_space<vmem>>, vector<16x768xbf16>
    %c0_3 = arith.constant 0 : index
    %c0_4 = arith.constant 0 : index
    %2 = vector.load %arg3[%c0_3, %c0_4] : memref<768x256xbf16, #tpu.memory_space<vmem>>, vector<768x256xbf16>
    %cst = arith.constant dense<0.000000e+00> : vector<16x256xf32>
    %3 = tpu.matmul %0, %2, %cst {dimension_numbers = #tpu.dot_dimension_numbers<[1], [0], [0], [1], [0, 0, 1, 1], [], []>} : vector<16x768xbf16>, vector<768x256xbf16>, vector<16x256xf32> -> vector<16x256xf32>
    %c0_5 = arith.constant 0 : index
    %c0_6 = arith.constant 0 : index
    %4 = vector.load %arg4[%c0_5, %c0_6] : memref<768x256xbf16, #tpu.memory_space<vmem>>, vector<768x256xbf16>
    %cst_7 = arith.constant dense<0.000000e+00> : vector<16x256xf32>
    %5 = tpu.matmul %1, %4, %cst_7 {dimension_numbers = #tpu.dot_dimension_numbers<[1], [0], [0], [1], [0, 0, 1, 1], [], []>} : vector<16x768xbf16>, vector<768x256xbf16>, vector<16x256xf32> -> vector<16x256xf32>
    %6 = arith.addf %3, %5 : vector<16x256xf32>
    %c0_8 = arith.constant 0 : index
    %c0_9 = arith.constant 0 : index
    %7 = vector.load %arg5[%c0_8, %c0_9] : memref<1x256xf32, #tpu.memory_space<vmem>>, vector<1x256xf32>
    %8 = vector.broadcast %7 : vector<1x256xf32> to vector<16x256xf32>
    %9 = arith.addf %6, %8 : vector<16x256xf32>
    %c0_10 = arith.constant 0 : index
    %c0_11 = arith.constant 0 : index
    %10 = vector.load %arg6[%c0_10, %c0_11] : memref<1x256xf32, #tpu.memory_space<vmem>>, vector<1x256xf32>
    %c0_12 = arith.constant 0 : index
    %c0_13 = arith.constant 0 : index
    %11 = vector.load %arg7[%c0_12, %c0_13] : memref<1x256xf32, #tpu.memory_space<vmem>>, vector<1x256xf32>
    %cst_14 = arith.constant dense<0.000000e+00> : vector<16xf32>
    %12 = vector.multi_reduction <add>, %9, %cst_14 [1] : vector<16x256xf32> to vector<16xf32>
    %13 = vector.shape_cast %12 : vector<16xf32> to vector<16x1xf32>
    %cst_15 = arith.constant 2.560000e+02 : f32
    %14 = vector.broadcast %cst_15 : f32 to vector<16x1xf32>
    %15 = arith.divf %13, %14 : vector<16x1xf32>
    %16 = arith.mulf %9, %9 : vector<16x256xf32>
    %cst_16 = arith.constant dense<0.000000e+00> : vector<16xf32>
    %17 = vector.multi_reduction <add>, %16, %cst_16 [1] : vector<16x256xf32> to vector<16xf32>
    %18 = vector.shape_cast %17 : vector<16xf32> to vector<16x1xf32>
    %cst_17 = arith.constant 2.560000e+02 : f32
    %19 = vector.broadcast %cst_17 : f32 to vector<16x1xf32>
    %20 = arith.divf %18, %19 : vector<16x1xf32>
    %21 = arith.mulf %15, %15 : vector<16x1xf32>
    %22 = arith.subf %20, %21 : vector<16x1xf32>
    %23 = vector.broadcast %15 : vector<16x1xf32> to vector<16x256xf32>
    %24 = arith.subf %9, %23 : vector<16x256xf32>
    %cst_18 = arith.constant 9.99999974E-6 : f32
    %25 = vector.broadcast %cst_18 : f32 to vector<16x1xf32>
    %26 = arith.addf %22, %25 : vector<16x1xf32>
    %27 = math.rsqrt %26 : vector<16x1xf32>
    %28 = vector.broadcast %27 : vector<16x1xf32> to vector<16x256xf32>
    %29 = arith.mulf %24, %28 : vector<16x256xf32>
    %30 = vector.broadcast %10 : vector<1x256xf32> to vector<16x256xf32>
    %31 = arith.mulf %29, %30 : vector<16x256xf32>
    %32 = vector.broadcast %11 : vector<1x256xf32> to vector<16x256xf32>
    %33 = arith.addf %31, %32 : vector<16x256xf32>
    %cst_19 = arith.constant 0.000000e+00 : f32
    %34 = vector.broadcast %cst_19 : f32 to vector<16x256xf32>
    %35 = arith.maximumf %33, %34 : vector<16x256xf32>
    %36 = arith.truncf %35 : vector<16x256xf32> to vector<16x256xbf16>
    %c0_20 = arith.constant 0 : index
    %c0_21 = arith.constant 0 : index
    %37 = vector.load %arg8[%c0_20, %c0_21] : memref<256x128xbf16, #tpu.memory_space<vmem>>, vector<256x128xbf16>
    %cst_22 = arith.constant dense<0.000000e+00> : vector<16x128xf32>
    %38 = tpu.matmul %36, %37, %cst_22 {dimension_numbers = #tpu.dot_dimension_numbers<[1], [0], [0], [1], [0, 0, 1, 1], [], []>} : vector<16x256xbf16>, vector<256x128xbf16>, vector<16x128xf32> -> vector<16x128xf32>
    %c0_23 = arith.constant 0 : index
    %c0_24 = arith.constant 0 : index
    %39 = vector.load %arg9[%c0_23, %c0_24] : memref<1x128xf32, #tpu.memory_space<vmem>>, vector<1x128xf32>
    %40 = vector.broadcast %39 : vector<1x128xf32> to vector<16x128xf32>
    %41 = arith.addf %38, %40 : vector<16x128xf32>
    %c0_25 = arith.constant 0 : index
    %c0_26 = arith.constant 0 : index
    %42 = vector.load %arg10[%c0_25, %c0_26] : memref<1x128xf32, #tpu.memory_space<vmem>>, vector<1x128xf32>
    %c0_27 = arith.constant 0 : index
    %c0_28 = arith.constant 0 : index
    %43 = vector.load %arg11[%c0_27, %c0_28] : memref<1x128xf32, #tpu.memory_space<vmem>>, vector<1x128xf32>
    %cst_29 = arith.constant dense<0.000000e+00> : vector<16xf32>
    %44 = vector.multi_reduction <add>, %41, %cst_29 [1] : vector<16x128xf32> to vector<16xf32>
    %45 = vector.shape_cast %44 : vector<16xf32> to vector<16x1xf32>
    %cst_30 = arith.constant 1.280000e+02 : f32
    %46 = vector.broadcast %cst_30 : f32 to vector<16x1xf32>
    %47 = arith.divf %45, %46 : vector<16x1xf32>
    %48 = arith.mulf %41, %41 : vector<16x128xf32>
    %cst_31 = arith.constant dense<0.000000e+00> : vector<16xf32>
    %49 = vector.multi_reduction <add>, %48, %cst_31 [1] : vector<16x128xf32> to vector<16xf32>
    %50 = vector.shape_cast %49 : vector<16xf32> to vector<16x1xf32>
    %cst_32 = arith.constant 1.280000e+02 : f32
    %51 = vector.broadcast %cst_32 : f32 to vector<16x1xf32>
    %52 = arith.divf %50, %51 : vector<16x1xf32>
    %53 = arith.mulf %47, %47 : vector<16x1xf32>
    %54 = arith.subf %52, %53 : vector<16x1xf32>
    %55 = vector.broadcast %47 : vector<16x1xf32> to vector<16x128xf32>
    %56 = arith.subf %41, %55 : vector<16x128xf32>
    %cst_33 = arith.constant 9.99999974E-6 : f32
    %57 = vector.broadcast %cst_33 : f32 to vector<16x1xf32>
    %58 = arith.addf %54, %57 : vector<16x1xf32>
    %59 = math.rsqrt %58 : vector<16x1xf32>
    %60 = vector.broadcast %59 : vector<16x1xf32> to vector<16x128xf32>
    %61 = arith.mulf %56, %60 : vector<16x128xf32>
    %62 = vector.broadcast %42 : vector<1x128xf32> to vector<16x128xf32>
    %63 = arith.mulf %61, %62 : vector<16x128xf32>
    %64 = vector.broadcast %43 : vector<1x128xf32> to vector<16x128xf32>
    %65 = arith.addf %63, %64 : vector<16x128xf32>
    %cst_34 = arith.constant 0.000000e+00 : f32
    %66 = vector.broadcast %cst_34 : f32 to vector<16x128xf32>
    %67 = arith.maximumf %65, %66 : vector<16x128xf32>
    %68 = arith.truncf %67 : vector<16x128xf32> to vector<16x128xbf16>
    %c0_35 = arith.constant 0 : index
    %c0_36 = arith.constant 0 : index
    %69 = vector.load %arg12[%c0_35, %c0_36] : memref<128x256xbf16, #tpu.memory_space<vmem>>, vector<128x256xbf16>
    %cst_37 = arith.constant dense<0.000000e+00> : vector<16x256xf32>
    %70 = tpu.matmul %68, %69, %cst_37 {dimension_numbers = #tpu.dot_dimension_numbers<[1], [0], [0], [1], [0, 0, 1, 1], [], []>} : vector<16x128xbf16>, vector<128x256xbf16>, vector<16x256xf32> -> vector<16x256xf32>
    %c0_38 = arith.constant 0 : index
    %c0_39 = arith.constant 0 : index
    %71 = vector.load %arg13[%c0_38, %c0_39] : memref<1x256xf32, #tpu.memory_space<vmem>>, vector<1x256xf32>
    %72 = vector.broadcast %71 : vector<1x256xf32> to vector<16x256xf32>
    %73 = arith.addf %70, %72 : vector<16x256xf32>
    %74 = arith.negf %73 : vector<16x256xf32>
    %75 = math.exp %74 : vector<16x256xf32>
    %cst_40 = arith.constant 1.000000e+00 : f32
    %76 = vector.broadcast %cst_40 : f32 to vector<16x256xf32>
    %77 = arith.addf %76, %75 : vector<16x256xf32>
    %78 = arith.divf %76, %77 : vector<16x256xf32>
    %c0_41 = arith.constant 0 : index
    %c0_42 = arith.constant 0 : index
    %79 = vector.load %arg14[%c0_41, %c0_42] : memref<16x256xf32, #tpu.memory_space<vmem>>, vector<16x256xf32>
    tpu.vector_store %arg14[%c0_41, %c0_42], %78 {strides = array<i32>} : memref<16x256xf32, #tpu.memory_space<vmem>>, vector<16x256xf32>,
    return
  }
  func.func @transform_0(%arg0: i32) -> (i32, i32) {
    %c0_i32 = arith.constant 0 : i32
    %c0_i32_0 = arith.constant 0 : i32
    return %arg0, %c0_i32 : i32, i32
  }
  func.func @transform_1(%arg0: i32) -> (i32, i32) {
    %c0_i32 = arith.constant 0 : i32
    %c0_i32_0 = arith.constant 0 : i32
    return %arg0, %c0_i32 : i32, i32
  }
  func.func @transform_2(%arg0: i32) -> (i32, i32) {
    %c0_i32 = arith.constant 0 : i32
    %c0_i32_0 = arith.constant 0 : i32
    %c0_i32_1 = arith.constant 0 : i32
    return %c0_i32, %c0_i32_0 : i32, i32
  }
  func.func @transform_3(%arg0: i32) -> (i32, i32) {
    %c0_i32 = arith.constant 0 : i32
    %c0_i32_0 = arith.constant 0 : i32
    %c0_i32_1 = arith.constant 0 : i32
    return %c0_i32, %c0_i32_0 : i32, i32
  }
  func.func @transform_4(%arg0: i32) -> (i32, i32) {
    %c0_i32 = arith.constant 0 : i32
    %c0_i32_0 = arith.constant 0 : i32
    %c0_i32_1 = arith.constant 0 : i32
    return %c0_i32, %c0_i32_0 : i32, i32
  }
  func.func @transform_5(%arg0: i32) -> (i32, i32) {
    %c0_i32 = arith.constant 0 : i32
    %c0_i32_0 = arith.constant 0 : i32
    %c0_i32_1 = arith.constant 0 : i32
    return %c0_i32, %c0_i32_0 : i32, i32
  }
  func.func @transform_6(%arg0: i32) -> (i32, i32) {
    %c0_i32 = arith.constant 0 : i32
    %c0_i32_0 = arith.constant 0 : i32
    %c0_i32_1 = arith.constant 0 : i32
    return %c0_i32, %c0_i32_0 : i32, i32
  }
  func.func @transform_7(%arg0: i32) -> (i32, i32) {
    %c0_i32 = arith.constant 0 : i32
    %c0_i32_0 = arith.constant 0 : i32
    %c0_i32_1 = arith.constant 0 : i32
    return %c0_i32, %c0_i32_0 : i32, i32
  }
  func.func @transform_8(%arg0: i32) -> (i32, i32) {
    %c0_i32 = arith.constant 0 : i32
    %c0_i32_0 = arith.constant 0 : i32
    %c0_i32_1 = arith.constant 0 : i32
    return %c0_i32, %c0_i32_0 : i32, i32
  }
  func.func @transform_9(%arg0: i32) -> (i32, i32) {
    %c0_i32 = arith.constant 0 : i32
    %c0_i32_0 = arith.constant 0 : i32
    %c0_i32_1 = arith.constant 0 : i32
    return %c0_i32, %c0_i32_0 : i32, i32
  }
  func.func @transform_10(%arg0: i32) -> (i32, i32) {
    %c0_i32 = arith.constant 0 : i32
    %c0_i32_0 = arith.constant 0 : i32
    %c0_i32_1 = arith.constant 0 : i32
    return %c0_i32, %c0_i32_0 : i32, i32
  }
  func.func @transform_11(%arg0: i32) -> (i32, i32) {
    %c0_i32 = arith.constant 0 : i32
    %c0_i32_0 = arith.constant 0 : i32
    %c0_i32_1 = arith.constant 0 : i32
    return %c0_i32, %c0_i32_0 : i32, i32
  }
  func.func @transform_12(%arg0: i32) -> (i32, i32) {
    %c0_i32 = arith.constant 0 : i32
    %c0_i32_0 = arith.constant 0 : i32
    %c0_i32_1 = arith.constant 0 : i32
    return %c0_i32, %c0_i32_0 : i32, i32
  }
  func.func @transform_13(%arg0: i32) -> (i32, i32) {
    %c0_i32 = arith.constant 0 : i32
    %c0_i32_0 = arith.constant 0 : i32
    return %arg0, %c0_i32 : i32, i32
  }
}

</mosaic_0001>

<bundles_post_ra>
// kernel: tpu_custom_call.1
= control target key start
LH: loop header
LB: loop body
LE: loop exit
PB: predicated region body
PF: predicated region fallthrough
CT: control target
= control target key end

     0   :  { %18 = vsyncpa [#allocation3], 0  ;;  %s3547_s0 = inlined_call_operand.hbm [shape: bf16[16,768], index: 0, kind: input, shape index: {}]   ;;  %s3548_s1 = inlined_call_operand.hbm [shape: bf16[16,768], index: 1, kind: input, shape index: {}]   ;;  %s3549_s2 = inlined_call_operand.hbm [shape: bf16[768,256], index: 2, kind: input, shape index: {}]   ;;  %s3550_s3 = inlined_call_operand.hbm [shape: bf16[768,256], index: 3, kind: input, shape index: {}]   ;;  %s3551_s4 = inlined_call_operand.hbm [shape: f32[1,256], index: 4, kind: input, shape index: {}]   ;;  %s3552_s5 = inlined_call_operand.hbm [shape: f32[1,256], index: 5, kind: input, shape index: {}]   ;;  %s3553_s6 = inlined_call_operand.hbm [shape: f32[1,256], index: 6, kind: input, shape index: {}]   ;;  %s3554_s7 = inlined_call_operand.hbm [shape: bf16[256,128], index: 7, kind: input, shape index: {}]   ;;  %s3555_s8 = inlined_call_operand.hbm [shape: f32[1,128], index: 8, kind: input, shape index: {}]   ;;  %s3556_s9 = inlined_call_operand.hbm [shape: f32[1,128], index: 9, kind: input, shape index: {}]   ;;  %s3557_s10 = inlined_call_operand.hbm [shape: f32[1,128], index: 10, kind: input, shape index: {}]   ;;  %s3558_s11 = inlined_call_operand.hbm [shape: bf16[128,256], index: 11, kind: input, shape index: {}]   ;;  %s3559_s12 = inlined_call_operand.hbm [shape: f32[1,256], index: 12, kind: input, shape index: {}]   ;;  %s3560_s13 = inlined_call_operand.hbm [shape: f32[16,256], index: 13, kind: output, shape index: {}]  }
   0x1   :  { %19 = vsyncpa [#allocation6], 0 }
   0x2   :  { %20 = vsyncpa [#allocation9], 0 }
   0x3   :  { %21 = vsyncpa [#allocation12], 0 }
   0x4   :  { %22 = vsyncpa [#allocation15], 0 }
   0x5   :  { %23 = vsyncpa [#allocation18], 0 }
   0x6   :  { %24 = vsyncpa [#allocation21], 0 }
   0x7   :  { %25 = vsyncpa [#allocation4], 0  ;;  %s3209_s25 = smov [#allocation5]   ;;  %s2885_s29 = scalar_lea.hbm %s3548_s1, 768 }
   0x8   :  { %s43_s26 = sshll.u32 %s3209_s25, 4  ;;  %p2886_p0 = scmp.ne.s32.totalorder %s3548_s1, %s2885_s29  ;;  %s44_s26 = int_to_ptr.vmem [resolvable:$true] %s43_s26 }
   0x9   :  { %p2889_p1 = scmp.lt.u32.totalorder %s2885_s29, %s3548_s1 }
   0xb   :  { %p2891_p2 = pnand %p2889_p1, %p2886_p0 }
   0xd   :  { %2894 = shalt.err (!%p2891_p2)
}
   0xe   :  { %s2895_s17 = scalar_lea.vmem %s44_s26, 768  ;;  %p2900_p4 = scmp.lt.s32.totalorder %s44_s26, %s44_s26 }
   0xf   :  { %p2896_p3 = scmp.ne.s32.totalorder %s44_s26, %s2895_s17  ;;  %p2901_p5 = scmp.lt.s32.totalorder %s2895_s17, %s2895_s17 }
  0x11   :  { %p2902_p6 = por %p2901_p5, %p2900_p4 }
  0x13   :  { %p2903_p7 = pnand %p2902_p6, %p2896_p3 }
  0x15   :  { %2906 = shalt.err (!%p2903_p7)
}
  0x16   :  { %s3210_s18 = smov 384   ;;  %s3211_s19 = smov 24  }
  0x17   :  { %49 = dma.hbm_to_vmem [thread:$0]  %s3548_s1, 768, %s44_s26, [#allocation6], %s3210_s18, %s3210_s18, %s3211_s19  }
  0x18   :  { %s3212_s22 = smov [#allocation8]   ;;  %s3213_s24 = smov [#allocation11]  }
  0x19   :  { %s67_s23 = sshll.u32 %s3212_s22, 4  ;;  %s90_s25 = sshll.u32 %s3213_s24, 4  ;;  %s68_s23 = int_to_ptr.vmem [resolvable:$true] %s67_s23  ;;  %s91_s25 = int_to_ptr.vmem [resolvable:$true] %s90_s25 }
  0x1a   :  { %s2907_s29 = scalar_lea.hbm %s3550_s3, 12288 }
  0x1b   :  { %p2908_p8 = scmp.ne.s32.totalorder %s3550_s3, %s2907_s29  ;;  %p2911_p9 = scmp.lt.u32.totalorder %s2907_s29, %s3550_s3 }
  0x1d   :  { %p2913_p10 = pnand %p2911_p9, %p2908_p8 }
  0x1f   :  { %2916 = shalt.err (!%p2913_p10)
}
  0x20   :  { %s2917_s1 = scalar_lea.vmem %s68_s23, 12288  ;;  %p2922_p12 = scmp.lt.s32.totalorder %s68_s23, %s68_s23 }
  0x21   :  { %p2918_p11 = scmp.ne.s32.totalorder %s68_s23, %s2917_s1  ;;  %p2923_p13 = scmp.lt.s32.totalorder %s2917_s1, %s2917_s1 }
  0x23   :  { %p2924_p0 = por %p2923_p13, %p2922_p12 }
  0x25   :  { %p2925_p1 = pnand %p2924_p0, %p2918_p11 }
  0x27   :  { %2928 = shalt.err (!%p2925_p1)
}
  0x28   :  { %s3214_s26 = smov 128   ;;  %s3215_s17 = smov 8  }
  0x29   :  { %73 = dma.hbm_to_vmem [thread:$0]  %s3550_s3, 12288, %s68_s23, [#allocation9], %s3214_s26, %s3214_s26, %s3215_s17  }
  0x2a   :  { %s2929_s27 = scalar_lea.hbm %s3552_s5, 32 }
  0x2b   :  { %p2930_p2 = scmp.ne.s32.totalorder %s3552_s5, %s2929_s27  ;;  %p2933_p3 = scmp.lt.u32.totalorder %s2929_s27, %s3552_s5 }
  0x2d   :  { %p2935_p4 = pnand %p2933_p3, %p2930_p2 }
  0x2f   :  { %2938 = shalt.err (!%p2935_p4)
}
  0x30   :  { %s2939_s15 = scalar_lea.vmem %s91_s25, 32  ;;  %p2944_p6 = scmp.lt.s32.totalorder %s91_s25, %s91_s25 }
  0x31   :  { %p2940_p5 = scmp.ne.s32.totalorder %s91_s25, %s2939_s15  ;;  %p2945_p7 = scmp.lt.s32.totalorder %s2939_s15, %s2939_s15 }
  0x33   :  { %p2946_p8 = por %p2945_p7, %p2944_p6 }
  0x35   :  { %p2947_p9 = pnand %p2946_p8, %p2940_p5 }
  0x37   :  { %2950 = shalt.err (!%p2947_p9)
}
  0x38   :  { %93 = dma.hbm_to_vmem [thread:$0]  %s3552_s5, 32, %s91_s25, [#allocation12]  }
  0x39   :  { %s3216_s16 = smov [#allocation14]   ;;  %s2951_s22 = scalar_lea.hbm %s3554_s7, 2048 }
  0x3a   :  { %s109_s1 = sshll.u32 %s3216_s16, 4  ;;  %p2952_p10 = scmp.ne.s32.totalorder %s3554_s7, %s2951_s22  ;;  %s110_s1 = int_to_ptr.vmem [resolvable:$true] %s109_s1 }
  0x3b   :  { %p2955_p11 = scmp.lt.u32.totalorder %s2951_s22, %s3554_s7 }
  0x3d   :  { %p2957_p12 = pnand %p2955_p11, %p2952_p10 }
  0x3f   :  { %2960 = shalt.err (!%p2957_p12)
}
  0x40   :  { %s2961_s30 = scalar_lea.vmem %s110_s1, 2048  ;;  %p2966_p0 = scmp.lt.s32.totalorder %s110_s1, %s110_s1 }
  0x41   :  { %p2962_p13 = scmp.ne.s32.totalorder %s110_s1, %s2961_s30  ;;  %p2967_p1 = scmp.lt.s32.totalorder %s2961_s30, %s2961_s30 }
  0x43   :  { %p2968_p2 = por %p2967_p1, %p2966_p0 }
  0x45   :  { %p2969_p3 = pnand %p2968_p2, %p2962_p13 }
  0x47   :  { %2972 = shalt.err (!%p2969_p3)
}
  0x48   :  { %s3217_s5 = smov 64   ;;  %s3218_s25 = smov 4  }
  0x49   :  { %115 = dma.hbm_to_vmem [thread:$0]  %s3554_s7, 2048, %s110_s1, [#allocation15], %s3217_s5, %s3217_s5, %s3218_s25  }
  0x4a   :  { %s3219_s3 = smov [#allocation17]   ;;  %s3220_s16 = smov [#allocation20]  }
  0x4b   :  { %s132_s23 = sshll.u32 %s3219_s3, 4  ;;  %s151_s20 = sshll.u32 %s3220_s16, 4  ;;  %s133_s23 = int_to_ptr.vmem [resolvable:$true] %s132_s23  ;;  %s3356_s20 = int_to_ptr.vmem [resolvable:$true] %s151_s20 }
  0x4c   :  { %s2973_s24 = scalar_lea.hbm %s3556_s9, 16 }
  0x4d   :  { %p2974_p4 = scmp.ne.s32.totalorder %s3556_s9, %s2973_s24  ;;  %p2977_p5 = scmp.lt.u32.totalorder %s2973_s24, %s3556_s9 }
  0x4f   :  { %p2979_p6 = pnand %p2977_p5, %p2974_p4 }
  0x51   :  { %2982 = shalt.err (!%p2979_p6)
}
  0x52   :  { %s2983_s7 = scalar_lea.vmem %s133_s23, 16  ;;  %s2987_s1 = scalar_lea.vmem %s133_s23, 32 }
  0x53   :  { %p2984_p7 = scmp.ne.s32.totalorder %s133_s23, %s2983_s7  ;;  %p2988_p8 = scmp.lt.s32.totalorder %s133_s23, %s133_s23 }
  0x54   :  { %p2989_p9 = scmp.lt.s32.totalorder %s2987_s1, %s2983_s7 }
  0x56   :  { %p2990_p10 = por %p2989_p9, %p2988_p8 }
  0x58   :  { %p2991_p11 = pnand %p2990_p10, %p2984_p7 }
  0x5a   :  { %2994 = shalt.err (!%p2991_p11)
}
  0x5b   :  { %135 = dma.hbm_to_vmem [thread:$0]  %s3556_s9, 16, %s133_s23, [#allocation18]  }
  0x5c   :  { %s2995_s3 = scalar_lea.hbm %s3558_s11, 2048 }
  0x5d   :  { %p2996_p12 = scmp.ne.s32.totalorder %s3558_s11, %s2995_s3  ;;  %p2999_p13 = scmp.lt.u32.totalorder %s2995_s3, %s3558_s11 }
  0x5f   :  { %p3001_p0 = pnand %p2999_p13, %p2996_p12 }
  0x61   :  { %3004 = shalt.err (!%p3001_p0)
}
  0x62   :  { %s3005_s27 = scalar_lea.vmem %s3356_s20, 2048  ;;  %p3010_p2 = scmp.lt.s32.totalorder %s3356_s20, %s3356_s20 }
  0x63   :  { %p3006_p1 = scmp.ne.s32.totalorder %s3356_s20, %s3005_s27  ;;  %p3011_p3 = scmp.lt.s32.totalorder %s3005_s27, %s3005_s27 }
  0x65   :  { %p3012_p4 = por %p3011_p3, %p3010_p2 }
  0x67   :  { %p3013_p5 = pnand %p3012_p4, %p3006_p1 }
  0x69   :  { %3016 = shalt.err (!%p3013_p5)
}
  0x6a   :  { %157 = dma.hbm_to_vmem [thread:$0]  %s3558_s11, 2048, %s3356_s20, [#allocation21], %s3214_s26, %s3214_s26, %s3215_s17  }
  0x6b   :  { %s3221_s28 = smov [#allocation2]   ;;  %s3222_s30 = smov [#allocation7]  }
  0x6c   :  { %s31_s29 = sshll.u32 %s3221_s28, 4  ;;  %s55_s7 = sshll.u32 %s3222_s30, 4  ;;  %s32_s29 = int_to_ptr.vmem [resolvable:$true] %s31_s29  ;;  %s3390_s7 = int_to_ptr.vmem [resolvable:$true] %s55_s7 }
  0x6d   :  { %s3017_s25 = scalar_lea.hbm %s3547_s0, 768 }
  0x6e   :  { %p3018_p6 = scmp.ne.s32.totalorder %s3547_s0, %s3017_s25  ;;  %p3021_p7 = scmp.lt.u32.totalorder %s3017_s25, %s3547_s0 }
  0x70   :  { %p3023_p8 = pnand %p3021_p7, %p3018_p6 }
  0x72   :  { %3026 = shalt.err (!%p3023_p8)
}
  0x73   :  { %s3027_s11 = scalar_lea.vmem %s32_s29, 768  ;;  %p3032_p10 = scmp.lt.s32.totalorder %s32_s29, %s32_s29 }
  0x74   :  { %p3028_p9 = scmp.ne.s32.totalorder %s32_s29, %s3027_s11  ;;  %p3033_p11 = scmp.lt.s32.totalorder %s3027_s11, %s3027_s11 }
  0x76   :  { %p3034_p12 = por %p3033_p11, %p3032_p10 }
  0x78   :  { %p3035_p13 = pnand %p3034_p12, %p3028_p9 }
  0x7a   :  { %3038 = shalt.err (!%p3035_p13)
}
  0x7b   :  { %37 = dma.hbm_to_vmem [thread:$0]  %s3547_s0, 768, %s32_s29, [#allocation3], %s3210_s18, %s3210_s18, %s3211_s19  }
  0x7c   :  { %s3039_s27 = scalar_lea.hbm %s3549_s2, 12288 }
  0x7d   :  { %p3040_p0 = scmp.ne.s32.totalorder %s3549_s2, %s3039_s27  ;;  %p3043_p1 = scmp.lt.u32.totalorder %s3039_s27, %s3549_s2 }
  0x7f   :  { %p3045_p2 = pnand %p3043_p1, %p3040_p0 }
  0x81   :  { %3048 = shalt.err (!%p3045_p2)
}
  0x82   :  { %s3049_s1 = scalar_lea.vmem %s3390_s7, 12288  ;;  %p3054_p4 = scmp.lt.s32.totalorder %s3390_s7, %s3390_s7 }
  0x83   :  { %p3050_p3 = scmp.ne.s32.totalorder %s3390_s7, %s3049_s1  ;;  %p3055_p5 = scmp.lt.s32.totalorder %s3049_s1, %s3049_s1 }
  0x85   :  { %p3056_p6 = por %p3055_p5, %p3054_p4 }
  0x87   :  { %p3057_p7 = pnand %p3056_p6, %p3050_p3 }
  0x89   :  { %3060 = shalt.err (!%p3057_p7)
}
  0x8a   :  { %61 = dma.hbm_to_vmem [thread:$0]  %s3549_s2, 12288, %s3390_s7, [#allocation6], %s3214_s26, %s3214_s26, %s3215_s17  }
  0x8b   :  { %s3223_s19 = smov [#allocation10]   ;;  %s3224_s5 = smov [#allocation13]  }
  0x8c   :  { %s80_s29 = sshll.u32 %s3223_s19, 4  ;;  %s100_s25 = sshll.u32 %s3224_s5, 4  ;;  %s81_s29 = int_to_ptr.vmem [resolvable:$true] %s80_s29  ;;  %s101_s25 = int_to_ptr.vmem [resolvable:$true] %s100_s25 }
  0x8d   :  { %s3061_s3 = scalar_lea.hbm %s3551_s4, 32 }
  0x8e   :  { %p3062_p8 = scmp.ne.s32.totalorder %s3551_s4, %s3061_s3  ;;  %p3065_p9 = scmp.lt.u32.totalorder %s3061_s3, %s3551_s4 }
  0x90   :  { %p3067_p10 = pnand %p3065_p9, %p3062_p8 }
  0x92   :  { %3070 = shalt.err (!%p3067_p10)
}
  0x93   :  { %s3071_s2 = scalar_lea.vmem %s81_s29, 32  ;;  %p3076_p12 = scmp.lt.s32.totalorder %s81_s29, %s81_s29 }
  0x94   :  { %p3072_p11 = scmp.ne.s32.totalorder %s81_s29, %s3071_s2  ;;  %p3077_p13 = scmp.lt.s32.totalorder %s3071_s2, %s3071_s2 }
  0x96   :  { %p3078_p0 = por %p3077_p13, %p3076_p12 }
  0x98   :  { %p3079_p1 = pnand %p3078_p0, %p3072_p11 }
  0x9a   :  { %3082 = shalt.err (!%p3079_p1)
}
  0x9b   :  { %83 = dma.hbm_to_vmem [thread:$0]  %s3551_s4, 32, %s81_s29, [#allocation9]  }
  0x9c   :  { %s3083_s24 = scalar_lea.hbm %s3553_s6, 32 }
  0x9d   :  { %p3084_p2 = scmp.ne.s32.totalorder %s3553_s6, %s3083_s24  ;;  %p3087_p3 = scmp.lt.u32.totalorder %s3083_s24, %s3553_s6 }
  0x9f   :  { %p3089_p4 = pnand %p3087_p3, %p3084_p2 }
  0xa1   :  { %3092 = shalt.err (!%p3089_p4)
}
  0xa2   :  { %s3093_s30 = scalar_lea.vmem %s101_s25, 32  ;;  %p3098_p6 = scmp.lt.s32.totalorder %s101_s25, %s101_s25 }
  0xa3   :  { %p3094_p5 = scmp.ne.s32.totalorder %s101_s25, %s3093_s30  ;;  %p3099_p7 = scmp.lt.s32.totalorder %s3093_s30, %s3093_s30 }
  0xa5   :  { %p3100_p8 = por %p3099_p7, %p3098_p6 }
  0xa7   :  { %p3101_p9 = pnand %p3100_p8, %p3094_p5 }
  0xa9   :  { %3104 = shalt.err (!%p3101_p9)
}
  0xaa   :  { %103 = dma.hbm_to_vmem [thread:$0]  %s3553_s6, 32, %s101_s25, [#allocation12]  }
  0xab   :  { %s3225_s0 = smov [#allocation16]   ;;  %s3226_s19 = smov [#allocation19]  }
  0xac   :  { %s122_s18 = sshll.u32 %s3225_s0, 4  ;;  %s142_s29 = sshll.u32 %s3226_s19, 4  ;;  %s123_s18 = int_to_ptr.vmem [resolvable:$true] %s122_s18  ;;  %s143_s29 = int_to_ptr.vmem [resolvable:$true] %s142_s29 }
  0xad   :  { %s3105_s15 = scalar_lea.hbm %s3555_s8, 16 }
  0xae   :  { %p3106_p10 = scmp.ne.s32.totalorder %s3555_s8, %s3105_s15  ;;  %p3109_p11 = scmp.lt.u32.totalorder %s3105_s15, %s3555_s8 }
  0xb0   :  { %p3111_p12 = pnand %p3109_p11, %p3106_p10 }
  0xb2   :  { %3114 = shalt.err (!%p3111_p12)
}
  0xb3   :  { %s3115_s6 = scalar_lea.vmem %s123_s18, 16  ;;  %s3119_s25 = scalar_lea.vmem %s123_s18, 32 }
  0xb4   :  { %p3116_p13 = scmp.ne.s32.totalorder %s123_s18, %s3115_s6  ;;  %p3120_p0 = scmp.lt.s32.totalorder %s123_s18, %s123_s18 }
  0xb5   :  { %p3121_p1 = scmp.lt.s32.totalorder %s3119_s25, %s3115_s6 }
  0xb7   :  { %p3122_p2 = por %p3121_p1, %p3120_p0 }
  0xb9   :  { %p3123_p3 = pnand %p3122_p2, %p3116_p13 }
  0xbb   :  { %3126 = shalt.err (!%p3123_p3)
}
  0xbc   :  { %125 = dma.hbm_to_vmem [thread:$0]  %s3555_s8, 16, %s123_s18, [#allocation15]  }
  0xbd   :  { %s3127_s7 = scalar_lea.hbm %s3557_s10, 16 }
  0xbe   :  { %p3128_p4 = scmp.ne.s32.totalorder %s3557_s10, %s3127_s7  ;;  %p3131_p5 = scmp.lt.u32.totalorder %s3127_s7, %s3557_s10 }
  0xc0   :  { %p3133_p6 = pnand %p3131_p5, %p3128_p4 }
  0xc2   :  { %3136 = shalt.err (!%p3133_p6)
}
  0xc3   :  { %s3137_s23 = scalar_lea.vmem %s143_s29, 16  ;;  %s3141_s28 = scalar_lea.vmem %s143_s29, 32 }
  0xc4   :  { %p3138_p7 = scmp.ne.s32.totalorder %s143_s29, %s3137_s23  ;;  %p3142_p8 = scmp.lt.s32.totalorder %s143_s29, %s143_s29 }
  0xc5   :  { %p3143_p9 = scmp.lt.s32.totalorder %s3141_s28, %s3137_s23 }
  0xc7   :  { %p3144_p10 = por %p3143_p9, %p3142_p8 }
  0xc9   :  { %p3145_p11 = pnand %p3144_p10, %p3138_p7 }
  0xcb   :  { %3148 = shalt.err (!%p3145_p11)
}
  0xcc   :  { %145 = dma.hbm_to_vmem [thread:$0]  %s3557_s10, 16, %s143_s29, [#allocation18]  }
  0xcd   :  { %s3227_s4 = smov [#allocation22]   ;;  %s3149_s19 = scalar_lea.hbm %s3559_s12, 32 }
  0xce   :  { %s164_s1 = sshll.u32 %s3227_s4, 4  ;;  %p3150_p12 = scmp.ne.s32.totalorder %s3559_s12, %s3149_s19  ;;  %s165_s1 = int_to_ptr.vmem [resolvable:$true] %s164_s1 }
  0xcf   :  { %p3153_p13 = scmp.lt.u32.totalorder %s3149_s19, %s3559_s12 }
  0xd1   :  { %p3155_p0 = pnand %p3153_p13, %p3150_p12 }
  0xd3   :  { %3158 = shalt.err (!%p3155_p0)
}
  0xd4   :  { %s3159_s16 = scalar_lea.vmem %s165_s1, 32  ;;  %p3164_p2 = scmp.lt.s32.totalorder %s165_s1, %s165_s1 }
  0xd5   :  { %p3160_p1 = scmp.ne.s32.totalorder %s165_s1, %s3159_s16  ;;  %p3165_p3 = scmp.lt.s32.totalorder %s3159_s16, %s3159_s16 }
  0xd7   :  { %p3166_p4 = por %p3165_p3, %p3164_p2 }
  0xd9   :  { %p3167_p5 = pnand %p3166_p4, %p3160_p1 }
  0xdb   :  { %3170 = shalt.err (!%p3167_p5)
}
  0xdc   :  { %167 = dma.hbm_to_vmem [thread:$0]  %s3559_s12, 32, %s165_s1, [#allocation21]  }
  0xdd   :  { %3193 = dma.done.wait [#allocation3], 768  }
  0xde   :  { %3194 = vsyncadd [#allocation3], 4294966528 }
  0xdf   :  { %3195 = dma.done.wait [#allocation6], 13056  }
  0xe0   :  { %3196 = vsyncadd [#allocation6], 4294954240 }
  0xe1   :  { %3197 = dma.done.wait [#allocation9], 12320  }
  0xe2   :  { %3198 = vsyncadd [#allocation9], 4294954976 }
  0xe3   :  { %3199 = dma.done.wait [#allocation12], 64  }
  0xe4   :  { %3200 = vsyncadd [#allocation12], 4294967232 }
  0xe5   :  { %3201 = dma.done.wait [#allocation15], 2064  }
  0xe6   :  { %3202 = vsyncadd [#allocation15], 4294965232 }
  0xe7   :  { %3203 = dma.done.wait [#allocation18], 32  }
  0xe8   :  { %3204 = vsyncadd [#allocation18], 4294967264 }
  0xe9   :  { %3205 = dma.done.wait [#allocation21], 2080  }
  0xea   :  { %3206 = vsyncadd [#allocation21], 4294965216  ;;  %v2515_v0 = vld [vmem:[#allocation8 + $0x204] ss:$8 sps:$4 sm:$0xff]   ;;  %v2517_v1 = vld [vmem:[#allocation8 + $0x200] ss:$8 sps:$4 sm:$0xff]  }
  0xeb   :  { %1008 = vmatprep.subr.bf16.mxu0 %v2515_v0  ;;  %v2518_v2 = vld [vmem:[#allocation8 + $0x214] ss:$8 sps:$4 sm:$0xff]   ;;  %v2520_v3 = vld [vmem:[#allocation8 + $0x210] ss:$8 sps:$4 sm:$0xff]   ;;  %v2521_v4 = vld [vmem:[#allocation8 + $0x224] ss:$8 sps:$4 sm:$0xff]  }
  0xec   :  { %1009 = vmatpush1.bf16.msra.mxu0 %v2517_v1  ;;  %v2523_v5 = vld [vmem:[#allocation8 + $0x220] ss:$8 sps:$4 sm:$0xff]   ;;  %v2524_v6 = vld [vmem:[#allocation8 + $0x234] ss:$8 sps:$4 sm:$0xff]   ;;  %v2526_v7 = vld [vmem:[#allocation8 + $0x230] ss:$8 sps:$4 sm:$0xff]  }
  0xed   :  { %1010 = vmatprep.subr.bf16.mxu0 %v2518_v2  ;;  %v2527_v8 = vld [vmem:[#allocation8 + $0x244] ss:$8 sps:$4 sm:$0xff]   ;;  %v2529_v9 = vld [vmem:[#allocation8 + $0x240] ss:$8 sps:$4 sm:$0xff]   ;;  %v2530_v10 = vld [vmem:[#allocation8 + $0x254] ss:$8 sps:$4 sm:$0xff]  }
  0xee   :  { %v2532_v11 = vld [vmem:[#allocation8 + $0x250] ss:$8 sps:$4 sm:$0xff]   ;;  %v2533_v12 = vld [vmem:[#allocation8 + $0x264] ss:$8 sps:$4 sm:$0xff]   ;;  %v2565_v14 = vld [vmem:[#allocation8] ss:$8 sps:$4 sm:$0xff]  }
  0xef   :  { %v2563_v13 = vld [vmem:[#allocation8 + $0x4] ss:$8 sps:$4 sm:$0xff]   ;;  %v2535_v15 = vld [vmem:[#allocation8 + $0x260] ss:$8 sps:$4 sm:$0xff]   ;;  %v2536_v17 = vld [vmem:[#allocation8 + $0x274] ss:$8 sps:$4 sm:$0xff]  }
  0xf0   :  { %1011 = vmatpush1.bf16.msra.mxu0 %v2520_v3  ;;  %v2568_v16 = vld [vmem:[#allocation5 + $0x14] ss:$24 sps:$4 sm:$0xff]   ;;  %922 = vmatprep.subr.bf16.mxu1 %v2563_v13  ;;  %v2574_v19 = vld [vmem:[#allocation8 + $0x10] ss:$8 sps:$4 sm:$0xff]   ;;  %v2580_v23 = vld [vmem:[#allocation8 + $0x20] ss:$8 sps:$4 sm:$0xff]  }
  0xf1   :  { %1012 = vmatprep.subr.bf16.mxu0 %v2521_v4  ;;  %923 = vmatpush1.bf16.msra.mxu1 %v2565_v14  ;;  %v2572_v18 = vld [vmem:[#allocation8 + $0x14] ss:$8 sps:$4 sm:$0xff]   ;;  %v2538_v20 = vld [vmem:[#allocation8 + $0x270] ss:$8 sps:$4 sm:$0xff]   ;;  %v2539_v21 = vld [vmem:[#allocation8 + $0x284] ss:$8 sps:$4 sm:$0xff]  }
  0xf2   :  { %1040 = vmatprep.mubr.bf16.mxu0 %v2568_v16  ;;  %924 = vmatprep.subr.bf16.mxu1 %v2572_v18  ;;  %v2578_v22 = vld [vmem:[#allocation8 + $0x24] ss:$8 sps:$4 sm:$0xff]   ;;  %v2541_v24 = vld [vmem:[#allocation8 + $0x280] ss:$8 sps:$4 sm:$0xff]   ;;  %v2584_v25 = vld [vmem:[#allocation8 + $0x34] ss:$8 sps:$4 sm:$0xff]  }
  0xf3   :  { %v2542_v26 = vld [vmem:[#allocation8 + $0x294] ss:$8 sps:$4 sm:$0xff]   ;;  %v2586_v27 = vld [vmem:[#allocation8 + $0x30] ss:$8 sps:$4 sm:$0xff]   ;;  %v2590_v28 = vld [vmem:[#allocation8 + $0x44] ss:$8 sps:$4 sm:$0xff]  }
  0xf4   :  { %1013 = vmatpush1.bf16.msra.mxu0 %v2523_v5  ;;  %v2544_v29 = vld [vmem:[#allocation8 + $0x290] ss:$8 sps:$4 sm:$0xff]   ;;  %v2545_v30 = vld [vmem:[#allocation8 + $0x2a4] ss:$8 sps:$4 sm:$0xff]   ;;  %v2592_v31 = vld [vmem:[#allocation8 + $0x40] ss:$8 sps:$4 sm:$0xff]  }
  0xf5   :  { %1014 = vmatprep.subr.bf16.mxu0 %v2524_v6  ;;  %925 = vmatpush1.bf16.msra.mxu1 %v2574_v19  ;;  %v2596_v32 = vld [vmem:[#allocation8 + $0x54] ss:$8 sps:$4 sm:$0xff]   ;;  %v2547_v33 = vld [vmem:[#allocation8 + $0x2a0] ss:$8 sps:$4 sm:$0xff]   ;;  %v2598_v35 = vld [vmem:[#allocation8 + $0x50] ss:$8 sps:$4 sm:$0xff]  }
  0xf6   :  { %926 = vmatprep.subr.bf16.mxu1 %v2578_v22  ;;  %v2548_v34 = vld [vmem:[#allocation8 + $0x2b4] ss:$8 sps:$4 sm:$0xff]   ;;  %v2602_v36 = vld [vmem:[#allocation8 + $0x64] ss:$8 sps:$4 sm:$0xff]   ;;  %v2550_v37 = vld [vmem:[#allocation8 + $0x2b0] ss:$8 sps:$4 sm:$0xff]  }
  0xf7   :  { %v2551_v38 = vld [vmem:[#allocation8 + $0x2c4] ss:$8 sps:$4 sm:$0xff]   ;;  %v2604_v39 = vld [vmem:[#allocation8 + $0x60] ss:$8 sps:$4 sm:$0xff]   ;;  %v2608_v40 = vld [vmem:[#allocation8 + $0x74] ss:$8 sps:$4 sm:$0xff]  }
  0xf8   :  { %1015 = vmatpush1.bf16.msra.mxu0 %v2526_v7  ;;  %v2553_v41 = vld [vmem:[#allocation8 + $0x2c0] ss:$8 sps:$4 sm:$0xff]   ;;  %v2554_v42 = vld [vmem:[#allocation8 + $0x2d4] ss:$8 sps:$4 sm:$0xff]   ;;  %v2610_v43 = vld [vmem:[#allocation8 + $0x70] ss:$8 sps:$4 sm:$0xff]  }
  0xf9   :  { %1016 = vmatprep.subr.bf16.mxu0 %v2527_v8  ;;  %927 = vmatpush1.bf16.msra.mxu1 %v2580_v23  ;;  %v2614_v44 = vld [vmem:[#allocation8 + $0x84] ss:$8 sps:$4 sm:$0xff]   ;;  %v2556_v45 = vld [vmem:[#allocation8 + $0x2d0] ss:$8 sps:$4 sm:$0xff]   ;;  %v2616_v47 = vld [vmem:[#allocation8 + $0x80] ss:$8 sps:$4 sm:$0xff]  }
  0xfa   :  { %928 = vmatprep.subr.bf16.mxu1 %v2584_v25  ;;  %v2557_v46 = vld [vmem:[#allocation8 + $0x2e4] ss:$8 sps:$4 sm:$0xff]   ;;  %v2620_v48 = vld [vmem:[#allocation8 + $0x94] ss:$8 sps:$4 sm:$0xff]   ;;  %v2559_v49 = vld [vmem:[#allocation8 + $0x2e0] ss:$8 sps:$4 sm:$0xff]  }
  0xfb   :  { %v2560_v50 = vld [vmem:[#allocation8 + $0x2f4] ss:$8 sps:$4 sm:$0xff]   ;;  %v2622_v51 = vld [vmem:[#allocation8 + $0x90] ss:$8 sps:$4 sm:$0xff]   ;;  %v2626_v52 = vld [vmem:[#allocation8 + $0xa4] ss:$8 sps:$4 sm:$0xff]  }
  0xfc   :  { %1017 = vmatpush1.bf16.msra.mxu0 %v2529_v9  ;;  %v2562_v53 = vld [vmem:[#allocation8 + $0x2f0] ss:$8 sps:$4 sm:$0xff]   ;;  %v2571_v54 = vld [vmem:[#allocation7 + $0x4] ss:$8 sps:$4 sm:$0xff]   ;;  %v2628_v55 = vld [vmem:[#allocation8 + $0xa0] ss:$8 sps:$4 sm:$0xff]  }
  0xfd   :  { %1018 = vmatprep.subr.bf16.mxu0 %v2530_v10  ;;  %929 = vmatpush1.bf16.msra.mxu1 %v2586_v27  ;;  %v2566_v56 = vld [vmem:[#allocation5 + $0x10] ss:$24 sps:$4 sm:$0xff]   ;;  %v2632_v57 = vld [vmem:[#allocation8 + $0xb4] ss:$8 sps:$4 sm:$0xff]   ;;  %v2638_v61 = vld [vmem:[#allocation8 + $0xc4] ss:$8 sps:$4 sm:$0xff]  }
  0xfe   :  { %930 = vmatprep.subr.bf16.mxu1 %v2590_v28  ;;  %v2569_v58 = vld [vmem:[#allocation7] ss:$8 sps:$4 sm:$0xff]   ;;  %v2577_v59 = vld [vmem:[#allocation7 + $0x14] ss:$8 sps:$4 sm:$0xff]   ;;  %v2634_v60 = vld [vmem:[#allocation8 + $0xb0] ss:$8 sps:$4 sm:$0xff]  }
  0xff   :  { %v2664_v62 = vld [vmem:[#allocation5 + $0x4] ss:$24 sps:$4 sm:$0xff]   ;;  %v2575_v63 = vld [vmem:[#allocation7 + $0x10] ss:$8 sps:$4 sm:$0xff]   ;;  %v2640_v1 = vld [vmem:[#allocation8 + $0xc0] ss:$8 sps:$4 sm:$0xff]  }
 0x100   :  { %1019 = vmatpush1.bf16.msra.mxu0 %v2532_v11  ;;  %v2583_v0 = vld [vmem:[#allocation7 + $0x24] ss:$8 sps:$4 sm:$0xff]   ;;  %954 = vmatprep.mubr.bf16.mxu1 %v2664_v62  ;;  %v2644_v3 = vld [vmem:[#allocation8 + $0xd4] ss:$8 sps:$4 sm:$0xff]   ;;  %v2581_v4 = vld [vmem:[#allocation7 + $0x20] ss:$8 sps:$4 sm:$0xff]  }
 0x101   :  { %1020 = vmatprep.subr.bf16.mxu0 %v2533_v12  ;;  %931 = vmatpush1.bf16.msra.mxu1 %v2592_v31  ;;  %v2670_v2 = vld [vmem:[#allocation2 + $0x4] ss:$24 sps:$4 sm:$0xff]   ;;  %v2646_v6 = vld [vmem:[#allocation8 + $0xd0] ss:$8 sps:$4 sm:$0xff]   ;;  %v2652_v10 = vld [vmem:[#allocation8 + $0xe0] ss:$8 sps:$4 sm:$0xff]  }
 0x102   :  { %932 = vmatprep.subr.bf16.mxu1 %v2596_v32  ;;  %v2589_v5 = vld [vmem:[#allocation7 + $0x34] ss:$8 sps:$4 sm:$0xff]   ;;  %v2650_v7 = vld [vmem:[#allocation8 + $0xe4] ss:$8 sps:$4 sm:$0xff]   ;;  %v2587_v8 = vld [vmem:[#allocation7 + $0x30] ss:$8 sps:$4 sm:$0xff]  }
 0x103   :  { %v2595_v9 = vld [vmem:[#allocation7 + $0x44] ss:$8 sps:$4 sm:$0xff]   ;;  %v2656_v11 = vld [vmem:[#allocation8 + $0xf4] ss:$8 sps:$4 sm:$0xff]   ;;  %v2593_v12 = vld [vmem:[#allocation7 + $0x40] ss:$8 sps:$4 sm:$0xff]  }
 0x104   :  { %1021 = vmatpush1.bf16.msra.mxu0 %v2535_v15  ;;  %v2601_v13 = vld [vmem:[#allocation7 + $0x54] ss:$8 sps:$4 sm:$0xff]   ;;  %v2658_v14 = vld [vmem:[#allocation8 + $0xf0] ss:$8 sps:$4 sm:$0xff]   ;;  %v2667_v15 = vld [vmem:[#allocation8 + $0x104] ss:$8 sps:$4 sm:$0xff]  }
 0x105   :  { %1022 = vmatprep.subr.bf16.mxu0 %v2536_v17  ;;  %933 = vmatpush1.bf16.msra.mxu1 %v2598_v35  ;;  %v2599_v16 = vld [vmem:[#allocation7 + $0x50] ss:$8 sps:$4 sm:$0xff]   ;;  %v2607_v17 = vld [vmem:[#allocation7 + $0x64] ss:$8 sps:$4 sm:$0xff]   ;;  %v2665_v19 = vld [vmem:[#allocation8 + $0x100] ss:$8 sps:$4 sm:$0xff]  }
 0x106   :  { %934 = vmatprep.subr.bf16.mxu1 %v2602_v36  ;;  %v2662_v18 = vld [vmem:[#allocation5] ss:$24 sps:$4 sm:$0xff]   ;;  %v2613_v22 = vld [vmem:[#allocation7 + $0x74] ss:$8 sps:$4 sm:$0xff]   ;;  %v2694_v32 = vld [vmem:[#allocation8 + $0x144] ss:$8 sps:$4 sm:$0xff]  }
 0x107   :  { %v2674_v23 = vld [vmem:[#allocation8 + $0x110] ss:$8 sps:$4 sm:$0xff]   ;;  %v2680_v27 = vld [vmem:[#allocation8 + $0x120] ss:$8 sps:$4 sm:$0xff]   ;;  %v2688_v28 = vld [vmem:[#allocation8 + $0x134] ss:$8 sps:$4 sm:$0xff]  }
 0x108   :  { %1023 = vmatpush1.bf16.msra.mxu0 %v2538_v20  ;;  %v2676_v20 = vld [vmem:[#allocation8 + $0x114] ss:$8 sps:$4 sm:$0xff]   ;;  %v2611_v25 = vld [vmem:[#allocation7 + $0x70] ss:$8 sps:$4 sm:$0xff]   ;;  %v2692_v35 = vld [vmem:[#allocation8 + $0x140] ss:$8 sps:$4 sm:$0xff]  }
 0x109   :  { %1024 = vmatprep.subr.bf16.mxu0 %v2539_v21  ;;  %935 = vmatpush1.bf16.msra.mxu1 %v2604_v39  ;;  %v2605_v21 = vld [vmem:[#allocation7 + $0x60] ss:$8 sps:$4 sm:$0xff]   ;;  %v2686_v31 = vld [vmem:[#allocation8 + $0x130] ss:$8 sps:$4 sm:$0xff]   ;;  %v2700_v36 = vld [vmem:[#allocation8 + $0x154] ss:$8 sps:$4 sm:$0xff]  }
 0x10a   :  { %936 = vmatprep.subr.bf16.mxu1 %v2608_v40  ;;  %v2698_v39 = vld [vmem:[#allocation8 + $0x150] ss:$8 sps:$4 sm:$0xff]   ;;  %v2706_v40 = vld [vmem:[#allocation8 + $0x164] ss:$8 sps:$4 sm:$0xff]   ;;  %v2736_v62 = vld [vmem:[#allocation8 + $0x1b4] ss:$8 sps:$4 sm:$0xff]  }
 0x10b   :  { %s3229_s12 = smov [#allocation23]  }
 0x10c   :  { %1025 = vmatpush1.bf16.msra.mxu0 %v2541_v24  ;;  %v2682_v24 = vld [vmem:[#allocation8 + $0x124] ss:$8 sps:$4 sm:$0xff]   ;;  %s2189_s11 = sshll.u32 %s3229_s12, 4  ;;  %s2190_s11 = int_to_ptr.vmem [resolvable:$true] %s2189_s11 }
 0x10d   :  { %1026 = vmatprep.subr.bf16.mxu0 %v2542_v26  ;;  %937 = vmatpush1.bf16.msra.mxu1 %v2610_v43  ;;  %v2619_v26 = vld [vmem:[#allocation7 + $0x84] ss:$8 sps:$4 sm:$0xff]   ;;  %v2704_v43 = vld [vmem:[#allocation8 + $0x160] ss:$8 sps:$4 sm:$0xff]   ;;  %s3171_s20 = scalar_lea.vmem %s2190_s11, 512  ;;  %p3176_p7 = scmp.lt.s32.totalorder %s2190_s11, %s2190_s11 }
 0x10e   :  { %938 = vmatprep.subr.bf16.mxu1 %v2614_v44  ;;  %v2712_v44 = vld [vmem:[#allocation8 + $0x174] ss:$8 sps:$4 sm:$0xff]   ;;  %p3172_p6 = scmp.ne.s32.totalorder %s2190_s11, %s3171_s20  ;;  %p3177_p8 = scmp.lt.s32.totalorder %s3171_s20, %s3171_s20 }
 0x110   :  { %1027 = vmatpush1.bf16.msra.mxu0 %v2544_v29  ;;  %v2617_v29 = vld [vmem:[#allocation7 + $0x80] ss:$8 sps:$4 sm:$0xff]   ;;  %p3178_p9 = por %p3177_p8, %p3176_p7 }
 0x111   :  { %1028 = vmatprep.subr.bf16.mxu0 %v2545_v30  ;;  %939 = vmatpush1.bf16.msra.mxu1 %v2616_v47  ;;  %v2625_v30 = vld [vmem:[#allocation7 + $0x94] ss:$8 sps:$4 sm:$0xff]  }
 0x112   :  { %940 = vmatprep.subr.bf16.mxu1 %v2620_v48  ;;  %v2649_v47 = vld [vmem:[#allocation7 + $0xd4] ss:$8 sps:$4 sm:$0xff]   ;;  %v2710_v48 = vld [vmem:[#allocation8 + $0x170] ss:$8 sps:$4 sm:$0xff]   ;;  %p3179_p10 = pnand %p3178_p9, %p3172_p6 }
 0x114   :  { %1029 = vmatpush1.bf16.msra.mxu0 %v2547_v33  ;;  %v2623_v33 = vld [vmem:[#allocation7 + $0x90] ss:$8 sps:$4 sm:$0xff]  }
 0x115   :  { %1030 = vmatprep.subr.bf16.mxu0 %v2548_v34  ;;  %941 = vmatpush1.bf16.msra.mxu1 %v2622_v51  ;;  %v2631_v34 = vld [vmem:[#allocation7 + $0xa4] ss:$8 sps:$4 sm:$0xff]  }
 0x116   :  { %942 = vmatprep.subr.bf16.mxu1 %v2626_v52  ;;  %v2655_v51 = vld [vmem:[#allocation7 + $0xe4] ss:$8 sps:$4 sm:$0xff]   ;;  %v2716_v52 = vld [vmem:[#allocation8 + $0x180] ss:$8 sps:$4 sm:$0xff]  }
 0x118   :  { %1031 = vmatpush1.bf16.msra.mxu0 %v2550_v37  ;;  %v2629_v37 = vld [vmem:[#allocation7 + $0xa0] ss:$8 sps:$4 sm:$0xff]  }
 0x119   :  { %1032 = vmatprep.subr.bf16.mxu0 %v2551_v38  ;;  %943 = vmatpush1.bf16.msra.mxu1 %v2628_v55  ;;  %v2637_v38 = vld [vmem:[#allocation7 + $0xb4] ss:$8 sps:$4 sm:$0xff]  }
 0x11a   :  { %944 = vmatprep.subr.bf16.mxu1 %v2632_v57  ;;  %v2661_v55 = vld [vmem:[#allocation7 + $0xf4] ss:$8 sps:$4 sm:$0xff]   ;;  %v2730_v57 = vld [vmem:[#allocation8 + $0x1a4] ss:$8 sps:$4 sm:$0xff]  }
 0x11c   :  { %1033 = vmatpush1.bf16.msra.mxu0 %v2553_v41  ;;  %v2635_v41 = vld [vmem:[#allocation7 + $0xb0] ss:$8 sps:$4 sm:$0xff]  }
 0x11d   :  { %1034 = vmatprep.subr.bf16.mxu0 %v2554_v42  ;;  %945 = vmatpush1.bf16.msra.mxu1 %v2634_v60  ;;  %v2643_v42 = vld [vmem:[#allocation7 + $0xc4] ss:$8 sps:$4 sm:$0xff]   ;;  %v2728_v60 = vld [vmem:[#allocation8 + $0x1a0] ss:$8 sps:$4 sm:$0xff]  }
 0x11e   :  { %946 = vmatprep.subr.bf16.mxu1 %v2638_v61  ;;  %v2668_v61 = vld [vmem:[#allocation2] ss:$24 sps:$4 sm:$0xff]  }
 0x120   :  { %1035 = vmatpush1.bf16.msra.mxu0 %v2556_v45  ;;  %v2641_v45 = vld [vmem:[#allocation7 + $0xc0] ss:$8 sps:$4 sm:$0xff]  }
 0x121   :  { %1036 = vmatprep.subr.bf16.mxu0 %v2557_v46  ;;  %947 = vmatpush1.bf16.msra.mxu1 %v2640_v1  ;;  %v2766_v46 = vld [vmem:[#allocation5 + $0xc] ss:$24 sps:$4 sm:$0xff]  }
 0x122   :  { %948 = vmatprep.subr.bf16.mxu1 %v2644_v3  ;;  %v2679_v1 = vld [vmem:[#allocation7 + $0x114] ss:$8 sps:$4 sm:$0xff]   ;;  %v2742_v3 = vld [vmem:[#allocation8 + $0x1c4] ss:$8 sps:$4 sm:$0xff]  }
 0x124   :  { %1037 = vmatpush1.bf16.msra.mxu0 %v2559_v49  ;;  %v2718_v49 = vld [vmem:[#allocation8 + $0x184] ss:$8 sps:$4 sm:$0xff]  }
 0x125   :  { %1038 = vmatprep.subr.bf16.mxu0 %v2560_v50  ;;  %949 = vmatpush1.bf16.msra.mxu1 %v2646_v6  ;;  %v2647_v50 = vld [vmem:[#allocation7 + $0xd0] ss:$8 sps:$4 sm:$0xff]   ;;  %v2740_v6 = vld [vmem:[#allocation8 + $0x1c0] ss:$8 sps:$4 sm:$0xff]  }
 0x126   :  { %950 = vmatprep.subr.bf16.mxu1 %v2650_v7  ;;  %v2683_v7 = vld [vmem:[#allocation7 + $0x120] ss:$8 sps:$4 sm:$0xff]  }
 0x128   :  { %1039 = vmatpush1.bf16.msra.mxu0 %v2562_v53  ;;  %v2724_v53 = vld [vmem:[#allocation8 + $0x194] ss:$8 sps:$4 sm:$0xff]  }
 0x129   :  { %1561 = vmatprep.subr.bf16.mxu0 %v2571_v54  ;;  %951 = vmatpush1.bf16.msra.mxu1 %v2652_v10  ;;  %v2653_v54 = vld [vmem:[#allocation7 + $0xe0] ss:$8 sps:$4 sm:$0xff]   ;;  %v2746_v10 = vld [vmem:[#allocation8 + $0x1d0] ss:$8 sps:$4 sm:$0xff]  }
 0x12a   :  { %952 = vmatprep.subr.bf16.mxu1 %v2656_v11  ;;  %v2754_v11 = vld [vmem:[#allocation8 + $0x1e4] ss:$8 sps:$4 sm:$0xff]  }
 0x12b   :  { %1041 = vmatmul.mubr.bf16.vlgmr.msra.gmra.mrb[0].mxu0 %v2566_v56  ;;  %v2722_v56 = vld [vmem:[#allocation8 + $0x190] ss:$8 sps:$4 sm:$0xff]  }
 0x12c   :  { %1562 = vmatpush1.bf16.msra.mxu0 %v2569_v58  ;;  %1593 = vmatprep.mubr.bf16.mxu0 %v2670_v2  ;;  %v2659_v58 = vld [vmem:[#allocation7 + $0xf0] ss:$8 sps:$4 sm:$0xff]  }
 0x12d   :  { %1563 = vmatprep.subr.bf16.mxu0 %v2577_v59  ;;  %953 = vmatpush1.bf16.msra.mxu1 %v2658_v14  ;;  %v2673_v59 = vld [vmem:[#allocation7 + $0x104] ss:$8 sps:$4 sm:$0xff]   ;;  %v2734_v2 = vld [vmem:[#allocation8 + $0x1b0] ss:$8 sps:$4 sm:$0xff]   ;;  %v2752_v14 = vld [vmem:[#allocation8 + $0x1e0] ss:$8 sps:$4 sm:$0xff]  }
 0x12e   :  { %965 = vmatprep.subr.bf16.mxu1 %v2667_v15  ;;  %v2760_v15 = vld [vmem:[#allocation8 + $0x1f4] ss:$8 sps:$4 sm:$0xff]  }
 0x130   :  { %1564 = vmatpush1.bf16.msra.mxu0 %v2575_v63  ;;  %955 = vmatmul.mubr.bf16.vlgmr.msra.gmra.mrb[0].mxu1 %v2662_v18  ;;  %v2671_v63 = vld [vmem:[#allocation7 + $0x100] ss:$8 sps:$4 sm:$0xff]   ;;  %v2758_v18 = vld [vmem:[#allocation8 + $0x1f0] ss:$8 sps:$4 sm:$0xff]  }
 0x131   :  { %1565 = vmatprep.subr.bf16.mxu0 %v2583_v0  ;;  %966 = vmatpush1.bf16.msra.mxu1 %v2665_v19  ;;  %v2769_v0 = vld [vmem:[#allocation2 + $0xc] ss:$24 sps:$4 sm:$0xff]   ;;  %v2701_v19 = vld [vmem:[#allocation7 + $0x150] ss:$8 sps:$4 sm:$0xff]  }
 0x132   :  { %967 = vmatprep.subr.bf16.mxu1 %v2676_v20  ;;  %997 = vmatprep.mubr.bf16.mxu1 %v2766_v46  ;;  %v2709_v20 = vld [vmem:[#allocation7 + $0x164] ss:$8 sps:$4 sm:$0xff]   ;;  %v2773_v46 = vld [vmem:[#allocation7 + $0x210] ss:$8 sps:$4 sm:$0xff]  }
 0x134   :  { %1566 = vmatpush1.bf16.msra.mxu0 %v2581_v4  ;;  %v2677_v4 = vld [vmem:[#allocation7 + $0x110] ss:$8 sps:$4 sm:$0xff]  }
 0x135   :  { %1567 = vmatprep.subr.bf16.mxu0 %v2589_v5  ;;  %968 = vmatpush1.bf16.msra.mxu1 %v2674_v23  ;;  %v2685_v5 = vld [vmem:[#allocation7 + $0x124] ss:$8 sps:$4 sm:$0xff]   ;;  %v2715_v23 = vld [vmem:[#allocation7 + $0x174] ss:$8 sps:$4 sm:$0xff]  }
 0x136   :  { %969 = vmatprep.subr.bf16.mxu1 %v2682_v24  ;;  %v2713_v24 = vld [vmem:[#allocation7 + $0x170] ss:$8 sps:$4 sm:$0xff]  }
 0x138   :  { %1568 = vmatpush1.bf16.msra.mxu0 %v2587_v8  ;;  %v2748_v8 = vld [vmem:[#allocation8 + $0x1d4] ss:$8 sps:$4 sm:$0xff]  }
 0x139   :  { %1569 = vmatprep.subr.bf16.mxu0 %v2595_v9  ;;  %970 = vmatpush1.bf16.msra.mxu1 %v2680_v27  ;;  %v2691_v9 = vld [vmem:[#allocation7 + $0x134] ss:$8 sps:$4 sm:$0xff]  }
 0x13a   :  { %971 = vmatprep.subr.bf16.mxu1 %v2688_v28  ;;  %v2727_v27 = vld [vmem:[#allocation7 + $0x194] ss:$8 sps:$4 sm:$0xff]   ;;  %v2725_v28 = vld [vmem:[#allocation7 + $0x190] ss:$8 sps:$4 sm:$0xff]  }
 0x13c   :  { %1570 = vmatpush1.bf16.msra.mxu0 %v2593_v12  ;;  %v2689_v12 = vld [vmem:[#allocation7 + $0x130] ss:$8 sps:$4 sm:$0xff]  }
 0x13d   :  { %1571 = vmatprep.subr.bf16.mxu0 %v2601_v13  ;;  %972 = vmatpush1.bf16.msra.mxu1 %v2686_v31  ;;  %v2697_v13 = vld [vmem:[#allocation7 + $0x144] ss:$8 sps:$4 sm:$0xff]   ;;  %v2739_v31 = vld [vmem:[#allocation7 + $0x1b4] ss:$8 sps:$4 sm:$0xff]  }
 0x13e   :  { %973 = vmatprep.subr.bf16.mxu1 %v2694_v32  ;;  %v2737_v32 = vld [vmem:[#allocation7 + $0x1b0] ss:$8 sps:$4 sm:$0xff]  }
 0x140   :  { %1572 = vmatpush1.bf16.msra.mxu0 %v2599_v16  ;;  %v2695_v16 = vld [vmem:[#allocation7 + $0x140] ss:$8 sps:$4 sm:$0xff]  }
 0x141   :  { %1573 = vmatprep.subr.bf16.mxu0 %v2607_v17  ;;  %974 = vmatpush1.bf16.msra.mxu1 %v2692_v35  ;;  %v2703_v17 = vld [vmem:[#allocation7 + $0x154] ss:$8 sps:$4 sm:$0xff]  }
 0x142   :  { %975 = vmatprep.subr.bf16.mxu1 %v2700_v36  ;;  %v2751_v35 = vld [vmem:[#allocation7 + $0x1d4] ss:$8 sps:$4 sm:$0xff]   ;;  %v2749_v36 = vld [vmem:[#allocation7 + $0x1d0] ss:$8 sps:$4 sm:$0xff]  }
 0x144   :  { %1574 = vmatpush1.bf16.msra.mxu0 %v2605_v21  ;;  %v2764_v21 = vld [vmem:[#allocation5 + $0x8] ss:$24 sps:$4 sm:$0xff]  }
 0x145   :  { %1575 = vmatprep.subr.bf16.mxu0 %v2613_v22  ;;  %976 = vmatpush1.bf16.msra.mxu1 %v2698_v39  ;;  %v2707_v22 = vld [vmem:[#allocation7 + $0x160] ss:$8 sps:$4 sm:$0xff]   ;;  %v2763_v39 = vld [vmem:[#allocation7 + $0x1f4] ss:$8 sps:$4 sm:$0xff]  }
 0x146   :  { %977 = vmatprep.subr.bf16.mxu1 %v2706_v40  ;;  %v2761_v40 = vld [vmem:[#allocation7 + $0x1f0] ss:$8 sps:$4 sm:$0xff]  }
 0x148   :  { %1576 = vmatpush1.bf16.msra.mxu0 %v2611_v25  ;;  %v2721_v25 = vld [vmem:[#allocation7 + $0x184] ss:$8 sps:$4 sm:$0xff]  }
 0x149   :  { %1577 = vmatprep.subr.bf16.mxu0 %v2619_v26  ;;  %978 = vmatpush1.bf16.msra.mxu1 %v2704_v43  ;;  %v2719_v26 = vld [vmem:[#allocation7 + $0x180] ss:$8 sps:$4 sm:$0xff]  }
 0x14a   :  { %979 = vmatprep.subr.bf16.mxu1 %v2712_v44  ;;  %v2770_v43 = vld [vmem:[#allocation7 + $0x200] ss:$8 sps:$4 sm:$0xff]   ;;  %v2820_v44 = vld [vmem:[#allocation2 + $0x14] ss:$24 sps:$4 sm:$0xff]  }
 0x14c   :  { %1578 = vmatpush1.bf16.msra.mxu0 %v2617_v29  ;;  %v2733_v29 = vld [vmem:[#allocation7 + $0x1a4] ss:$8 sps:$4 sm:$0xff]  }
 0x14d   :  { %1579 = vmatprep.subr.bf16.mxu0 %v2625_v30  ;;  %980 = vmatpush1.bf16.msra.mxu1 %v2710_v48  ;;  %v2731_v30 = vld [vmem:[#allocation7 + $0x1a0] ss:$8 sps:$4 sm:$0xff]  }
 0x14e   :  { %981 = vmatprep.subr.bf16.mxu1 %v2718_v49  ;;  %v2776_v48 = vld [vmem:[#allocation7 + $0x220] ss:$8 sps:$4 sm:$0xff]   ;;  %v2781_v49 = vld [vmem:[#allocation7 + $0x234] ss:$8 sps:$4 sm:$0xff]  }
 0x150   :  { %1580 = vmatpush1.bf16.msra.mxu0 %v2623_v33  ;;  %v2745_v33 = vld [vmem:[#allocation7 + $0x1c4] ss:$8 sps:$4 sm:$0xff]  }
 0x151   :  { %1581 = vmatprep.subr.bf16.mxu0 %v2631_v34  ;;  %982 = vmatpush1.bf16.msra.mxu1 %v2716_v52  ;;  %v2743_v34 = vld [vmem:[#allocation7 + $0x1c0] ss:$8 sps:$4 sm:$0xff]  }
 0x152   :  { %983 = vmatprep.subr.bf16.mxu1 %v2724_v53  ;;  %v2782_v52 = vld [vmem:[#allocation7 + $0x240] ss:$8 sps:$4 sm:$0xff]   ;;  %v2787_v53 = vld [vmem:[#allocation7 + $0x254] ss:$8 sps:$4 sm:$0xff]  }
 0x154   :  { %1582 = vmatpush1.bf16.msra.mxu0 %v2629_v37  ;;  %v2757_v37 = vld [vmem:[#allocation7 + $0x1e4] ss:$8 sps:$4 sm:$0xff]  }
 0x155   :  { %1583 = vmatprep.subr.bf16.mxu0 %v2637_v38  ;;  %984 = vmatpush1.bf16.msra.mxu1 %v2722_v56  ;;  %v2755_v38 = vld [vmem:[#allocation7 + $0x1e0] ss:$8 sps:$4 sm:$0xff]  }
 0x156   :  { %985 = vmatprep.subr.bf16.mxu1 %v2730_v57  ;;  %v2788_v56 = vld [vmem:[#allocation7 + $0x260] ss:$8 sps:$4 sm:$0xff]   ;;  %v2793_v57 = vld [vmem:[#allocation7 + $0x274] ss:$8 sps:$4 sm:$0xff]  }
 0x158   :  { %1584 = vmatpush1.bf16.msra.mxu0 %v2635_v41  ;;  %v2772_v41 = vld [vmem:[#allocation7 + $0x204] ss:$8 sps:$4 sm:$0xff]  }
 0x159   :  { %1585 = vmatprep.subr.bf16.mxu0 %v2643_v42  ;;  %986 = vmatpush1.bf16.msra.mxu1 %v2728_v60  ;;  %v2767_v42 = vld [vmem:[#allocation2 + $0x8] ss:$24 sps:$4 sm:$0xff]  }
 0x15a   :  { %987 = vmatprep.subr.bf16.mxu1 %v2736_v62  ;;  %v2794_v60 = vld [vmem:[#allocation7 + $0x280] ss:$8 sps:$4 sm:$0xff]   ;;  %v2797_v62 = vld [vmem:[#allocation7 + $0x290] ss:$8 sps:$4 sm:$0xff]  }
 0x15c   :  { %1586 = vmatpush1.bf16.msra.mxu0 %v2641_v45  ;;  %v2775_v45 = vld [vmem:[#allocation7 + $0x214] ss:$8 sps:$4 sm:$0xff]  }
 0x15d   :  { %1587 = vmatprep.subr.bf16.mxu0 %v2649_v47  ;;  %988 = vmatpush1.bf16.msra.mxu1 %v2734_v2  ;;  %v2778_v47 = vld [vmem:[#allocation7 + $0x224] ss:$8 sps:$4 sm:$0xff]   ;;  %v2803_v2 = vld [vmem:[#allocation7 + $0x2b0] ss:$8 sps:$4 sm:$0xff]  }
 0x15e   :  { %989 = vmatprep.subr.bf16.mxu1 %v2742_v3  ;;  %v2808_v3 = vld [vmem:[#allocation7 + $0x2c4] ss:$8 sps:$4 sm:$0xff]  }
 0x160   :  { %1588 = vmatpush1.bf16.msra.mxu0 %v2647_v50  ;;  %v2779_v50 = vld [vmem:[#allocation7 + $0x230] ss:$8 sps:$4 sm:$0xff]  }
 0x161   :  { %1589 = vmatprep.subr.bf16.mxu0 %v2655_v51  ;;  %990 = vmatpush1.bf16.msra.mxu1 %v2740_v6  ;;  %v2784_v51 = vld [vmem:[#allocation7 + $0x244] ss:$8 sps:$4 sm:$0xff]   ;;  %v2809_v6 = vld [vmem:[#allocation7 + $0x2d0] ss:$8 sps:$4 sm:$0xff]  }
 0x162   :  { %991 = vmatprep.subr.bf16.mxu1 %v2748_v8  ;;  %v2812_v8 = vld [vmem:[#allocation7 + $0x2e0] ss:$8 sps:$4 sm:$0xff]  }
 0x164   :  { %1590 = vmatpush1.bf16.msra.mxu0 %v2653_v54  ;;  %v2785_v54 = vld [vmem:[#allocation7 + $0x250] ss:$8 sps:$4 sm:$0xff]  }
 0x165   :  { %1591 = vmatprep.subr.bf16.mxu0 %v2661_v55  ;;  %992 = vmatpush1.bf16.msra.mxu1 %v2746_v10  ;;  %v2790_v55 = vld [vmem:[#allocation7 + $0x264] ss:$8 sps:$4 sm:$0xff]   ;;  %v2815_v10 = vld [vmem:[#allocation7 + $0x2f0] ss:$8 sps:$4 sm:$0xff]  }
 0x166   :  { %993 = vmatprep.subr.bf16.mxu1 %v2754_v11  ;;  %v2818_v11 = vld [vmem:[#allocation2 + $0x10] ss:$24 sps:$4 sm:$0xff]  }
 0x168   :  { %1592 = vmatpush1.bf16.msra.mxu0 %v2659_v58  ;;  %v2791_v58 = vld [vmem:[#allocation7 + $0x270] ss:$8 sps:$4 sm:$0xff]  }
 0x169   :  { %1604 = vmatprep.subr.bf16.mxu0 %v2673_v59  ;;  %994 = vmatpush1.bf16.msra.mxu1 %v2752_v14  ;;  %v2796_v59 = vld [vmem:[#allocation7 + $0x284] ss:$8 sps:$4 sm:$0xff]  }
 0x16a   :  { %995 = vmatprep.subr.bf16.mxu1 %v2760_v15 }
 0x16b   :  { %1594 = vmatmul.mubr.bf16.vlgmr.msra.gmra.mrb[0].mxu0 %v2668_v61  ;;  %v2799_v61 = vld [vmem:[#allocation7 + $0x294] ss:$8 sps:$4 sm:$0xff]  }
 0x16c   :  { %1605 = vmatpush1.bf16.msra.mxu0 %v2671_v63  ;;  %1636 = vmatprep.mubr.bf16.mxu0 %v2769_v0  ;;  %v2802_v63 = vld [vmem:[#allocation7 + $0x2a4] ss:$8 sps:$4 sm:$0xff]   ;;  %v2800_v0 = vld [vmem:[#allocation7 + $0x2a0] ss:$8 sps:$4 sm:$0xff]  }
 0x16d   :  { %1606 = vmatprep.subr.bf16.mxu0 %v2679_v1  ;;  %996 = vmatpush1.bf16.msra.mxu1 %v2758_v18  ;;  %v2805_v1 = vld [vmem:[#allocation7 + $0x2b4] ss:$8 sps:$4 sm:$0xff]  }
 0x170   :  { %1607 = vmatpush1.bf16.msra.mxu0 %v2677_v4  ;;  %998 = vmatmul.mubr.bf16.vlgmr.msra.gmra.mrb[0].mxu1 %v2764_v21  ;;  %v2806_v4 = vld [vmem:[#allocation7 + $0x2c0] ss:$8 sps:$4 sm:$0xff]  }
 0x171   :  { %1608 = vmatprep.subr.bf16.mxu0 %v2685_v5  ;;  %v2811_v5 = vld [vmem:[#allocation7 + $0x2d4] ss:$8 sps:$4 sm:$0xff]  }
 0x174   :  { %1609 = vmatpush1.bf16.msra.mxu0 %v2683_v7  ;;  %v2814_v7 = vld [vmem:[#allocation7 + $0x2e4] ss:$8 sps:$4 sm:$0xff]  }
 0x175   :  { %1610 = vmatprep.subr.bf16.mxu0 %v2691_v9  ;;  %v2817_v9 = vld [vmem:[#allocation7 + $0x2f4] ss:$8 sps:$4 sm:$0xff]  }
 0x178   :  { %1611 = vmatpush1.bf16.msra.mxu0 %v2689_v12 }
 0x179   :  { %1612 = vmatprep.subr.bf16.mxu0 %v2697_v13 }
 0x17c   :  { %1613 = vmatpush1.bf16.msra.mxu0 %v2695_v16  ;;  %v1692_v16 = vlaneseq }
 0x17d   :  { %1614 = vmatprep.subr.bf16.mxu0 %v2703_v17 }
 0x17e   :  { %v1693_v17 = vshrl.u32 %v1692_v16, 7 }
 0x180   :  { %1615 = vmatpush1.bf16.msra.mxu0 %v2701_v19  ;;  %v3487_v18 = vsub.s32 0, %v1693_v17  ;;  %v1690_v19 = vld [vmem:[#allocation10] sm:$0x3] }
 0x181   :  { %1616 = vmatprep.subr.bf16.mxu0 %v2709_v20  ;;  %v3489_v20 = vsub.s32 1, %v1693_v17 }
 0x182   :  { %v1695_v21 = vrot.slane %v1690_v19, %v3487_v18 }
 0x184   :  { %1617 = vmatpush1.bf16.msra.mxu0 %v2707_v22 }
 0x185   :  { %1618 = vmatprep.subr.bf16.mxu0 %v2715_v23  ;;  %v1699_v23 = vrot.slane %v1690_v19, %v3489_v20 }
 0x188   :  { %1619 = vmatpush1.bf16.msra.mxu0 %v2713_v24 }
 0x189   :  { %1620 = vmatprep.subr.bf16.mxu0 %v2721_v25 }
 0x18c   :  { %1621 = vmatpush1.bf16.msra.mxu0 %v2719_v26 }
 0x18d   :  { %1622 = vmatprep.subr.bf16.mxu0 %v2727_v27 }
 0x190   :  { %1623 = vmatpush1.bf16.msra.mxu0 %v2725_v28 }
 0x191   :  { %1624 = vmatprep.subr.bf16.mxu0 %v2733_v29 }
 0x194   :  { %1625 = vmatpush1.bf16.msra.mxu0 %v2731_v30 }
 0x195   :  { %1626 = vmatprep.subr.bf16.mxu0 %v2739_v31 }
 0x198   :  { %1627 = vmatpush1.bf16.msra.mxu0 %v2737_v32 }
 0x199   :  { %1628 = vmatprep.subr.bf16.mxu0 %v2745_v33 }
 0x19c   :  { %1629 = vmatpush1.bf16.msra.mxu0 %v2743_v34 }
 0x19d   :  { %1630 = vmatprep.subr.bf16.mxu0 %v2751_v35 }
 0x1a0   :  { %1631 = vmatpush1.bf16.msra.mxu0 %v2749_v36 }
 0x1a1   :  { %1632 = vmatprep.subr.bf16.mxu0 %v2757_v37 }
 0x1a4   :  { %1633 = vmatpush1.bf16.msra.mxu0 %v2755_v38 }
 0x1a5   :  { %1634 = vmatprep.subr.bf16.mxu0 %v2763_v39 }
 0x1a8   :  { %1635 = vmatpush1.bf16.msra.mxu0 %v2761_v40 }
 0x1a9   :  { %1647 = vmatprep.subr.bf16.mxu0 %v2772_v41 }
 0x1ab   :  { %1637 = vmatmul.mubr.bf16.vlgmr.msra.gmra.mrb[0].mxu0 %v2767_v42 }
 0x1ac   :  { %1648 = vmatpush1.bf16.msra.mxu0 %v2770_v43  ;;  %1679 = vmatprep.mubr.bf16.mxu0 %v2820_v44  ;;  %v2821_v43 = vld [vmem:[#allocation14 + $0x40] sm:$0xff]  }
 0x1ad   :  { %1649 = vmatprep.subr.bf16.mxu0 %v2775_v45  ;;  %v2822_v44 = vld [vmem:[#allocation14] sm:$0xff]   ;;  %2450 = vmatprep.subr.bf16.mxu1 %v2821_v43  ;;  %v2823_v45 = vld [vmem:[#allocation14 + $0x48] sm:$0xff]  }
 0x1ae   :  { %2451 = vmatpush3.bf16.msra.mxu1 %v2822_v44 }
 0x1af   :  { %2452 = vmatprep.subr.bf16.mxu1 %v2823_v45 }
 0x1b0   :  { %1650 = vmatpush1.bf16.msra.mxu0 %v2773_v46  ;;  %v2824_v46 = vld [vmem:[#allocation14 + $0x8] sm:$0xff]  }
 0x1b1   :  { %1651 = vmatprep.subr.bf16.mxu0 %v2778_v47  ;;  %v2825_v47 = vld [vmem:[#allocation14 + $0x50] sm:$0xff]  }
 0x1b2   :  { %2453 = vmatpush3.bf16.msra.mxu1 %v2824_v46 }
 0x1b3   :  { %2454 = vmatprep.subr.bf16.mxu1 %v2825_v47 }
 0x1b4   :  { %1652 = vmatpush1.bf16.msra.mxu0 %v2776_v48  ;;  %v2826_v48 = vld [vmem:[#allocation14 + $0x10] sm:$0xff]  }
 0x1b5   :  { %1653 = vmatprep.subr.bf16.mxu0 %v2781_v49  ;;  %v2827_v49 = vld [vmem:[#allocation14 + $0x58] sm:$0xff]  }
 0x1b6   :  { %2455 = vmatpush3.bf16.msra.mxu1 %v2826_v48 }
 0x1b7   :  { %2456 = vmatprep.subr.bf16.mxu1 %v2827_v49 }
 0x1b8   :  { %1654 = vmatpush1.bf16.msra.mxu0 %v2779_v50  ;;  %v2828_v50 = vld [vmem:[#allocation14 + $0x18] sm:$0xff]  }
 0x1b9   :  { %1655 = vmatprep.subr.bf16.mxu0 %v2784_v51  ;;  %v2829_v51 = vld [vmem:[#allocation14 + $0x60] sm:$0xff]  }
 0x1ba   :  { %2457 = vmatpush3.bf16.msra.mxu1 %v2828_v50 }
 0x1bb   :  { %2458 = vmatprep.subr.bf16.mxu1 %v2829_v51 }
 0x1bc   :  { %1656 = vmatpush1.bf16.msra.mxu0 %v2782_v52  ;;  %v2830_v52 = vld [vmem:[#allocation14 + $0x20] sm:$0xff]  }
 0x1bd   :  { %1657 = vmatprep.subr.bf16.mxu0 %v2787_v53  ;;  %v2831_v53 = vld [vmem:[#allocation14 + $0x68] sm:$0xff]  }
 0x1be   :  { %2459 = vmatpush3.bf16.msra.mxu1 %v2830_v52  ;;  %v2839_v52 = vld [vmem:[#allocation20 + $0x4] ss:$8 sps:$4 sm:$0xff]  }
 0x1bf   :  { %2460 = vmatprep.subr.bf16.mxu1 %v2831_v53  ;;  %v2837_v53 = vld [vmem:[#allocation20] ss:$8 sps:$4 sm:$0xff]  }
 0x1c0   :  { %1658 = vmatpush1.bf16.msra.mxu0 %v2785_v54  ;;  %v2832_v54 = vld [vmem:[#allocation14 + $0x28] sm:$0xff]  }
 0x1c1   :  { %1659 = vmatprep.subr.bf16.mxu0 %v2790_v55  ;;  %v2833_v55 = vld [vmem:[#allocation14 + $0x70] sm:$0xff]  }
 0x1c2   :  { %2461 = vmatpush3.bf16.msra.mxu1 %v2832_v54  ;;  %v2842_v54 = vld [vmem:[#allocation20 + $0x14] ss:$8 sps:$4 sm:$0xff]  }
 0x1c3   :  { %2462 = vmatprep.subr.bf16.mxu1 %v2833_v55  ;;  %v2840_v55 = vld [vmem:[#allocation20 + $0x10] ss:$8 sps:$4 sm:$0xff]  }
 0x1c4   :  { %1660 = vmatpush1.bf16.msra.mxu0 %v2788_v56  ;;  %v2834_v56 = vld [vmem:[#allocation14 + $0x30] sm:$0xff]  }
 0x1c5   :  { %1661 = vmatprep.subr.bf16.mxu0 %v2793_v57  ;;  %v2835_v57 = vld [vmem:[#allocation14 + $0x78] sm:$0xff]  }
 0x1c6   :  { %2463 = vmatpush3.bf16.msra.mxu1 %v2834_v56  ;;  %v2845_v56 = vld [vmem:[#allocation20 + $0x24] ss:$8 sps:$4 sm:$0xff]  }
 0x1c7   :  { %2464 = vmatprep.subr.bf16.mxu1 %v2835_v57  ;;  %v2843_v57 = vld [vmem:[#allocation20 + $0x20] ss:$8 sps:$4 sm:$0xff]  }
 0x1c8   :  { %1662 = vmatpush1.bf16.msra.mxu0 %v2791_v58  ;;  %v2836_v58 = vld [vmem:[#allocation14 + $0x38] sm:$0xff]  }
 0x1c9   :  { %1663 = vmatprep.subr.bf16.mxu0 %v2796_v59 }
 0x1ca   :  { %2465 = vmatpush3.bf16.msra.mxu1 %v2836_v58  ;;  %v2848_v58 = vld [vmem:[#allocation20 + $0x34] ss:$8 sps:$4 sm:$0xff]  }
 0x1cb   :  { %2113 = vmatprep.subr.bf16.mxu1 %v2839_v52 }
 0x1cc   :  { %1664 = vmatpush1.bf16.msra.mxu0 %v2794_v60 }
 0x1cd   :  { %1665 = vmatprep.subr.bf16.mxu0 %v2799_v61 }
 0x1d0   :  { %1666 = vmatpush1.bf16.msra.mxu0 %v2797_v62 }
 0x1d1   :  { %1667 = vmatprep.subr.bf16.mxu0 %v2802_v63 }
 0x1d4   :  { %1668 = vmatpush1.bf16.msra.mxu0 %v2800_v0 }
 0x1d5   :  { %1669 = vmatprep.subr.bf16.mxu0 %v2805_v1 }
 0x1d8   :  { %1670 = vmatpush1.bf16.msra.mxu0 %v2803_v2 }
 0x1d9   :  { %1671 = vmatprep.subr.bf16.mxu0 %v2808_v3 }
 0x1dc   :  { %1672 = vmatpush1.bf16.msra.mxu0 %v2806_v4 }
 0x1dd   :  { %1673 = vmatprep.subr.bf16.mxu0 %v2811_v5 }
 0x1e0   :  { %1674 = vmatpush1.bf16.msra.mxu0 %v2809_v6 }
 0x1e1   :  { %1675 = vmatprep.subr.bf16.mxu0 %v2814_v7 }
 0x1e4   :  { %1676 = vmatpush1.bf16.msra.mxu0 %v2812_v8 }
 0x1e5   :  { %1677 = vmatprep.subr.bf16.mxu0 %v2817_v9  ;;  %v1706_v9 = vld [vmem:[#allocation11] sm:$0x3] }
 0x1e8   :  { %1678 = vmatpush1.bf16.msra.mxu0 %v2815_v10 }
 0x1eb   :  { %1680 = vmatmul.mubr.bf16.vlgmr.msra.gmra.mrb[0].mxu0 %v2818_v11 }
 0x243   :  { %v999_v12 = vpop.f32.mrb[0].mxu1 }
 0x244   :  { %v1001_v13 = vpop.f32.mrb[1].mxu1 }
 0x245   :  { %v1003_v14 = vpop.f32.mrb[2].mxu1 }
 0x246   :  { %v1005_v15 = vpop.f32.mrb[3].mxu1 }
 0x2be   :  { %v1681_v22 = vpop.f32.mrb[0].mxu0 }
 0x2bf   :  { %v2472_v24 = vadd.f32 %v1681_v22, %v999_v12  ;;  %v1683_v25 = vpop.f32.mrb[1].mxu0 }
 0x2c0   :  { %v2473_v26 = vadd.f32 %v1683_v25, %v1001_v13  ;;  %v1685_v27 = vpop.f32.mrb[2].mxu0  ;;  %v1707_v13 = vld [vmem:[#allocation13] sm:$0x3] }
 0x2c1   :  { %v3493_v28 = vadd.f32 %v2472_v24, %v1695_v21  ;;  %v2474_v29 = vadd.f32 %v1685_v27, %v1003_v14  ;;  %v1687_v30 = vpop.f32.mrb[3].mxu0  ;;  %v1749_v14 = vrot.slane %v1706_v9, %v3487_v18  ;;  %v1764_v19 = vrot.slane %v1707_v13, %v3487_v18 }
 0x2c2   :  { %v3495_v31 = vadd.f32 %v2473_v26, %v1699_v23  ;;  %v2475_v32 = vadd.f32 %v1687_v30, %v1005_v15  ;;  %v1753_v15 = vrot.slane %v1706_v9, %v3489_v20 }
 0x2c3   :  { %v3497_v33 = vadd.f32 %v2474_v29, %v1695_v21  ;;  %v1717_v34 = vmul.f32 %v3493_v28, %v3493_v28  ;;  %v1768_v21 = vrot.slane %v1707_v13, %v3489_v20 }
 0x2c4   :  { %v3501_v35 = vadd.f32 %v2475_v32, %v1699_v23  ;;  %v1708_v36 = vadd.f32 %v3495_v31, %v3493_v28  ;;  %v1718_v37 = vmul.f32 %v3495_v31, %v3495_v31 }
 0x2c5   :  { %v1719_v39 = vmul.f32 %v3497_v33, %v3497_v33 }
 0x2c6   :  { %1709 = vadd.xlane.f32.xlu0 %v1708_v36  ;;  %v1721_v38 = vadd.f32 %v1718_v37, %v1717_v34  ;;  %v1720_v40 = vmul.f32 %v3501_v35, %v3501_v35  ;;  %v1711_v41 = vadd.f32 %v3501_v35, %v3497_v33 }
 0x2c8   :  { %1722 = vadd.xlane.f32.xlu1 %v1721_v38  ;;  %v1724_v42 = vadd.f32 %v1720_v40, %v1719_v39 }
 0x2ca   :  { %1712 = vadd.xlane.f32.xlu0 %v1711_v41 }
 0x2cc   :  { %1725 = vadd.xlane.f32.xlu1 %v1724_v42 }
 0x353   :  { %v1710_v59 = vpop.xlane.xlu0 %1709 }
 0x354   :  { %v1715_v60 = vmul.f32 0.00390625, %v1710_v59  ;;  %v2846_v59 = vld [vmem:[#allocation20 + $0x30] ss:$8 sps:$4 sm:$0xff]  }
 0x355   :  { %v1723_v61 = vpop.xlane.xlu1 %1722 }
 0x356   :  { %v1727_v62 = vmul.f32 0.00390625, %v1723_v61  ;;  %v1729_v63 = vmul.f32 %v1715_v60, %v1715_v60  ;;  %v1733_v10 = vsub.f32 %v3493_v28, %v1715_v60  ;;  %v1734_v11 = vsub.f32 %v3495_v31, %v1715_v60  ;;  %v2851_v60 = vld [vmem:[#allocation20 + $0x44] ss:$8 sps:$4 sm:$0xff]   ;;  %v2849_v61 = vld [vmem:[#allocation20 + $0x40] ss:$8 sps:$4 sm:$0xff]  }
 0x357   :  { %v1713_v0 = vpop.xlane.xlu0 %1712 }
 0x358   :  { %v1731_v1 = vsub.f32 %v1727_v62, %v1729_v63  ;;  %v1716_v2 = vmul.f32 0.00390625, %v1713_v0  ;;  %v2854_v62 = vld [vmem:[#allocation20 + $0x54] ss:$8 sps:$4 sm:$0xff]   ;;  %v2852_v63 = vld [vmem:[#allocation20 + $0x50] ss:$8 sps:$4 sm:$0xff]  }
 0x359   :  { %v1726_v3 = vpop.xlane.xlu1 %1725  ;;  %v2855_v0 = vld [vmem:[#allocation20 + $0x60] ss:$8 sps:$4 sm:$0xff]  }
 0x35a   :  { %v1737_v4 = vadd.f32 1e-05, %v1731_v1  ;;  %v1728_v5 = vmul.f32 0.00390625, %v1726_v3  ;;  %v1730_v6 = vmul.f32 %v1716_v2, %v1716_v2  ;;  %v1735_v22 = vsub.f32 %v3497_v33, %v1716_v2  ;;  %v2857_v1 = vld [vmem:[#allocation20 + $0x64] ss:$8 sps:$4 sm:$0xff]  }
 0x35b   :  { %v1736_v23 = vsub.f32 %v3501_v35, %v1716_v2  ;;  %v2411_v35 = vld [vmem:[#allocation16] ss:$0 sm:$0xff]  ;;  %v2860_v2 = vld [vmem:[#allocation20 + $0x74] ss:$8 sps:$4 sm:$0xff]   ;;  %v3228_v3 = vmov 0  }
 0x35c   :  { %2861 = vrsqrt.f32 %v1737_v4  ;;  %v1732_v7 = vsub.f32 %v1728_v5, %v1730_v6  ;;  %v2858_v4 = vld [vmem:[#allocation20 + $0x70] ss:$8 sps:$4 sm:$0xff]  }
 0x35e   :  { %v1738_v8 = vadd.f32 1e-05, %v1732_v7 }
 0x360   :  { %2863 = vrsqrt.f32 %v1738_v8 }
 0x366   :  { %v2862_v12 = vpop.eup %2861 }
 0x367   :  { %v1742_v16 = vmul.f32 %v2862_v12, %v1734_v11  ;;  %v1741_v17 = vmul.f32 %v2862_v12, %v1733_v10 }
 0x369   :  { %v1757_v24 = vmul.f32 %v1753_v15, %v1742_v16  ;;  %v1756_v25 = vmul.f32 %v1749_v14, %v1741_v17 }
 0x36a   :  { %v2864_v26 = vpop.eup %2863 }
 0x36b   :  { %v1744_v27 = vmul.f32 %v2864_v26, %v1736_v23  ;;  %v1743_v28 = vmul.f32 %v2864_v26, %v1735_v22  ;;  %v1772_v30 = vadd.f32 %v1768_v21, %v1757_v24  ;;  %v1771_v32 = vadd.f32 %v1764_v19, %v1756_v25  ;;  %v2428_v23 = vld [vmem:[#allocation17] ss:$0 sm:$0xff] }
 0x36d   :  { %v1759_v29 = vmul.f32 %v1753_v15, %v1744_v27  ;;  %v1758_v31 = vmul.f32 %v1749_v14, %v1743_v28  ;;  %v1776_v37 = vmax.f32 %v1772_v30, 0.0  ;;  %v1775_v39 = vmax.f32 %v1771_v32, 0.0  ;;  %v2429_v27 = vld [vmem:[#allocation19] ss:$0 sm:$0xff] }
 0x36f   :  { %v1774_v34 = vadd.f32 %v1768_v21, %v1759_v29  ;;  %v1773_v36 = vadd.f32 %v1764_v19, %v1758_v31 }
 0x371   :  { %v1778_v38 = vmax.f32 %v1774_v34, 0.0  ;;  %v1777_v40 = vmax.f32 %v1773_v36, 0.0 }
 0x373   :  { %v1780_v41 = vpack.c.bf16 %v1778_v38, %v1776_v37  ;;  %v1779_v42 = vpack.c.bf16 %v1777_v40, %v1775_v39  ;;  %v2021_v38 = vld [vmem:[#allocation22] sm:$0x3] }
 0x374   :  { %v2026_v39 = vrot.slane %v2021_v38, %v3487_v18  ;;  %v2030_v40 = vrot.slane %v2021_v38, %v3489_v20 }
 0x375   :  { %1948 = vmatprep.mubr.bf16.mxu1 %v1780_v41 }
 0x376   :  { %1949 = vmatmul.mubr.bf16.vlgmr.msra.gmra.mrb[4].mxu1 %v1779_v42 }
 0x377   :  { %2114 = vmatpush1.bf16.msra.mxu1 %v2837_v53  ;;  %2145 = vmatprep.mubr.bf16.mxu1 %v3228_v3 }
 0x378   :  { %2115 = vmatprep.subr.bf16.mxu1 %v2842_v54 }
 0x37b   :  { %2116 = vmatpush1.bf16.msra.mxu1 %v2840_v55 }
 0x37c   :  { %2117 = vmatprep.subr.bf16.mxu1 %v2845_v56 }
 0x37f   :  { %2118 = vmatpush1.bf16.msra.mxu1 %v2843_v57 }
 0x380   :  { %2119 = vmatprep.subr.bf16.mxu1 %v2848_v58 }
 0x383   :  { %2120 = vmatpush1.bf16.msra.mxu1 %v2846_v59 }
 0x384   :  { %2121 = vmatprep.subr.bf16.mxu1 %v2851_v60 }
 0x387   :  { %2122 = vmatpush1.bf16.msra.mxu1 %v2849_v61 }
 0x388   :  { %2123 = vmatprep.subr.bf16.mxu1 %v2854_v62 }
 0x38b   :  { %2124 = vmatpush1.bf16.msra.mxu1 %v2852_v63 }
 0x38c   :  { %2125 = vmatprep.subr.bf16.mxu1 %v2857_v1 }
 0x38f   :  { %2126 = vmatpush1.bf16.msra.mxu1 %v2855_v0 }
 0x390   :  { %2127 = vmatprep.subr.bf16.mxu1 %v2860_v2 }
 0x393   :  { %2128 = vmatpush1.bf16.msra.mxu1 %v2858_v4 }
 0x449   :  { %v2466_v33 = vpop.f32.mrb[4].mxu1 }
 0x44a   :  { %v2467_v43 = vpop.f32.mrb[5].mxu1 }
 0x44b   :  { %v2468_v44 = vadd.f32 %v2467_v43, %v2466_v33  ;;  %v2469_v45 = vpop.f32.mrb[6].mxu1 }
 0x44c   :  { %v2470_v46 = vpop.f32.mrb[7].mxu1 }
 0x44d   :  { %v3521_v47 = vadd.f32 %v2468_v44, %v2411_v35  ;;  %v2471_v48 = vadd.f32 %v2470_v46, %v2469_v45 }
 0x44f   :  { %v3523_v49 = vadd.f32 %v2471_v48, %v2411_v35  ;;  %1959 = vadd.xlane.f32.xlu0 %v3521_v47  ;;  %v1966_v50 = vmul.f32 %v3521_v47, %v3521_v47 }
 0x451   :  { %1961 = vadd.xlane.f32.xlu1 %v3523_v49  ;;  %v1967_v51 = vmul.f32 %v3523_v49, %v3523_v49 }
 0x453   :  { %1968 = vadd.xlane.f32.xlu0 %v1966_v50 }
 0x455   :  { %1970 = vadd.xlane.f32.xlu1 %v1967_v51 }
 0x4dc   :  { %v1960_v5 = vpop.xlane.xlu0 %1959 }
 0x4dd   :  { %v1964_v6 = vmul.f32 0.0078125, %v1960_v5 }
 0x4de   :  { %v1962_v7 = vpop.xlane.xlu1 %1961 }
 0x4df   :  { %v1965_v8 = vmul.f32 0.0078125, %v1962_v7  ;;  %v1974_v10 = vmul.f32 %v1964_v6, %v1964_v6  ;;  %v1978_v21 = vsub.f32 %v3521_v47, %v1964_v6 }
 0x4e0   :  { %v1969_v9 = vpop.xlane.xlu0 %1968 }
 0x4e1   :  { %v1972_v11 = vmul.f32 0.0078125, %v1969_v9  ;;  %v1975_v13 = vmul.f32 %v1965_v8, %v1965_v8  ;;  %v1979_v24 = vsub.f32 %v3523_v49, %v1965_v8 }
 0x4e2   :  { %v1971_v12 = vpop.xlane.xlu1 %1970 }
 0x4e3   :  { %v1976_v14 = vsub.f32 %v1972_v11, %v1974_v10  ;;  %v1973_v15 = vmul.f32 0.0078125, %v1971_v12 }
 0x4e5   :  { %v1980_v16 = vadd.f32 1e-05, %v1976_v14  ;;  %v1977_v17 = vsub.f32 %v1973_v15, %v1975_v13 }
 0x4e7   :  { %2865 = vrsqrt.f32 %v1980_v16  ;;  %v1981_v19 = vadd.f32 1e-05, %v1977_v17 }
 0x4e9   :  { %2867 = vrsqrt.f32 %v1981_v19 }
 0x4f1   :  { %v2866_v22 = vpop.eup %2865 }
 0x4f2   :  { %v1984_v25 = vmul.f32 %v2866_v22, %v1978_v21 }
 0x4f3   :  { %v2868_v26 = vpop.eup %2867 }
 0x4f4   :  { %v1985_v28 = vmul.f32 %v2868_v26, %v1979_v24  ;;  %v1992_v29 = vmul.f32 %v2428_v23, %v1984_v25 }
 0x4f6   :  { %v1993_v30 = vmul.f32 %v2428_v23, %v1985_v28  ;;  %v2000_v31 = vadd.f32 %v2429_v27, %v1992_v29 }
 0x4f8   :  { %v2001_v32 = vadd.f32 %v2429_v27, %v1993_v30  ;;  %v2002_v34 = vmax.f32 %v2000_v31, 0.0 }
 0x4fa   :  { %v2003_v36 = vmax.f32 %v2001_v32, 0.0 }
 0x4fc   :  { %v2004_v37 = vpack.c.bf16 %v2003_v36, %v2002_v34 }
 0x4fe   :  { %2146 = vmatmul.mubr.bf16.vlgmr.msra.gmra.mrb[8].mxu1 %v2004_v37 }
 0x5d1   :  { %v2147_v41 = vpop.f32.mrb[8].mxu1 }
 0x5d2   :  { %v2148_v42 = vadd.f32 %v2147_v41, %v2026_v39  ;;  %v2149_v33 = vpop.f32.mrb[9].mxu1 }
 0x5d3   :  { %v2150_v35 = vadd.f32 %v2149_v33, %v2030_v40  ;;  %v2151_v43 = vpop.f32.mrb[10].mxu1 }
 0x5d4   :  { %v2446_v44 = vmul.f32 -1.442695, %v2148_v42  ;;  %v2152_v45 = vadd.f32 %v2151_v43, %v2026_v39  ;;  %v2153_v46 = vpop.f32.mrb[11].mxu1 }
 0x5d5   :  { %v2447_v47 = vmul.f32 -1.442695, %v2150_v35  ;;  %v2154_v48 = vadd.f32 %v2153_v46, %v2030_v40 }
 0x5d6   :  { %2869 = vpow2.f32 %v2446_v44  ;;  %v2448_v49 = vmul.f32 -1.442695, %v2152_v45 }
 0x5d7   :  { %2871 = vpow2.f32 %v2447_v47  ;;  %v2449_v50 = vmul.f32 -1.442695, %v2154_v48 }
 0x5d8   :  { %2873 = vpow2.f32 %v2448_v49 }
 0x5d9   :  { %2875 = vpow2.f32 %v2449_v50 }
 0x5e0   :  { %v2870_v51 = vpop.eup %2869 }
 0x5e1   :  { %v2872_v18 = vpop.eup %2871  ;;  %v2168_v52 = vadd.f32 1.0, %v2870_v51 }
 0x5e2   :  { %v2874_v20 = vpop.eup %2873  ;;  %v2169_v53 = vadd.f32 1.0, %v2872_v18 }
 0x5e3   :  { %v2876_v54 = vpop.eup %2875  ;;  %2877 = vrcp.f32 %v2168_v52  ;;  %v2170_v55 = vadd.f32 1.0, %v2874_v20 }
 0x5e4   :  { %2879 = vrcp.f32 %v2169_v53  ;;  %v2171_v56 = vadd.f32 1.0, %v2876_v54 }
 0x5e5   :  { %2881 = vrcp.f32 %v2170_v55 }
 0x5e6   :  { %2883 = vrcp.f32 %v2171_v56 }
 0x5ed   :  { %v2878_v57 = vpop.eup %2877 }
 0x5ee   :  { %v2880_v58 = vpop.eup %2879  ;;  %2180 = vst [vmem:[#allocation23] sm:$0xff] %v2878_v57 }
 0x5ef   :  { %v2882_v59 = vpop.eup %2881  ;;  %2181 = vst [vmem:[#allocation23 + $0x8] sm:$0xff] %v2880_v58 }
 0x5f0   :  { %v2884_v60 = vpop.eup %2883  ;;  %2182 = vst [vmem:[#allocation23 + $0x10] sm:$0xff] %v2882_v59 }
 0x5f1   :  { %2183 = vst [vmem:[#allocation23 + $0x18] sm:$0xff] %v2884_v60 }
 0x5f2   :  { %3182 = shalt.err (!%p3179_p10)
}
 0x5f3   :  { %s3183_s21 = scalar_lea.hbm %s3560_s13, 512 }
 0x5f4   :  { %p3184_p11 = scmp.ne.s32.totalorder %s3560_s13, %s3183_s21  ;;  %p3187_p12 = scmp.lt.u32.totalorder %s3183_s21, %s3560_s13 }
 0x5f6   :  { %p3189_p13 = pnand %p3187_p12, %p3184_p11 }
 0x5f8   :  { %3192 = shalt.err (!%p3189_p13)
}
 0x5f9   :  { %s3230_s22 = smov 256   ;;  %s3231_s24 = smov 16  }
 0x5fa   :  { %2195 = dma.vmem_to_hbm [thread:$0]  %s2190_s11, 512, %s3560_s13, [#allocation4], %s3230_s22, %s3230_s22, %s3231_s24  }
 0x5fb   :  { %3207 = dma.done.wait [#allocation4], 512  }
 0x5fc   :  { %3208 = vsyncadd [#allocation4], 4294966784 }
 0x5fd   :  { %2199 = vsyncpa [#allocation3], 1 }
 0x5fe   :  { %2200 = vsyncpa [#allocation6], 1 }
 0x5ff   :  { %2201 = vsyncpa [#allocation9], 1 }
 0x600   :  { %2202 = vsyncpa [#allocation12], 1 }
 0x601   :  { %2203 = vsyncpa [#allocation15], 1 }
 0x602   :  { %2204 = vsyncpa [#allocation18], 1 }
 0x603   :  { %2205 = vsyncpa [#allocation21], 1 }
 0x604   :  { %2206 = vsyncpa [#allocation4], 1 }

</bundles_post_ra>
